<compile_context>
chip_gen: v6e
topology: v6e:2x2x1
jax: 0.10.0
libtpu: 0.0.40
codegen_flags: <defaults>
</compile_context>

<pallas_src>
import functools
import math

import jax
import jax.numpy as jnp
from jax.experimental import pallas as pl
from jax.experimental.pallas import tpu as pltpu

LN_EPS = 1e-12
COMPUTE_DTYPE = jnp.bfloat16     # activation dtype between kernels
MATMUL_DTYPE = jnp.bfloat16      # weight storage dtype (MXU fast path)
VMEM_LIMIT = 64 * 1024 * 1024    # explicit scoped-VMEM limit (safe on v5e/v6e/v7x)


def _tile(dim, target, align):
    """Largest tile <= target that is a multiple of `align` and divides `dim`.

    Falls back to the full dimension (always a legal block) if no such divisor
    exists, so ragged shapes never produce partial blocks.
    """
    if dim <= target:
        return dim
    t = (target // align) * align
    while t >= align:
        if dim % t == 0:
            return t
        t -= align
    return dim


def _cparams(dimension_semantics):
    return pltpu.CompilerParams(
        dimension_semantics=dimension_semantics,
        vmem_limit_bytes=VMEM_LIMIT,
    )


# ----------------------------------------------------------------------------
# Add + LayerNorm (row-tiled)
# ----------------------------------------------------------------------------
def _add_layernorm_kernel(x_ref, res_ref, gamma_ref, beta_ref, o_ref):
    """o = LayerNorm(x + res) * gamma + beta, reduction over last dim (f32 math)."""
    x = x_ref[...].astype(jnp.float32) + res_ref[...].astype(jnp.float32)
    mean = jnp.mean(x, axis=-1, keepdims=True)
    var = jnp.mean(jnp.square(x - mean), axis=-1, keepdims=True)
    xn = (x - mean) * jax.lax.rsqrt(var + LN_EPS)
    out = xn * gamma_ref[...].astype(jnp.float32) + beta_ref[...].astype(jnp.float32)
    o_ref[...] = out.astype(o_ref.dtype)


def add_layernorm(x, res, gamma, beta, out_dtype=None):
    # x, res: (M, H); gamma, beta: (1, H)
    M, H = x.shape
    out_dtype = out_dtype or x.dtype
    tm = _tile(M, 512, 8)            # ~512 rows/block: near HBM roofline, pipelined
    return pl.pallas_call(
        _add_layernorm_kernel,
        out_shape=jax.ShapeDtypeStruct((M, H), out_dtype),
        grid=(M // tm,),
        in_specs=[
            pl.BlockSpec((tm, H), lambda i: (i, 0)),
            pl.BlockSpec((tm, H), lambda i: (i, 0)),
            pl.BlockSpec((1, H), lambda i: (0, 0)),
            pl.BlockSpec((1, H), lambda i: (0, 0)),
        ],
        out_specs=pl.BlockSpec((tm, H), lambda i: (i, 0)),
        compiler_params=_cparams(("parallel",)),
    )(x, res, gamma, beta)


# ----------------------------------------------------------------------------
# Tiled linear: o = activation(x @ w + b), bf16 matmul, f32 accumulator
# ----------------------------------------------------------------------------
def _linear_kernel(x_ref, w_ref, b_ref, o_ref, acc_ref, *, activation):
    @pl.when(pl.program_id(2) == 0)
    def _init():
        acc_ref[...] = jnp.zeros_like(acc_ref)

    acc_ref[...] += jnp.dot(
        x_ref[...], w_ref[...], preferred_element_type=jnp.float32
    )

    @pl.when(pl.program_id(2) == pl.num_programs(2) - 1)
    def _store():
        out = acc_ref[...] + b_ref[...].astype(jnp.float32)
        if activation == "gelu":
            # TODO(synk): HuggingFace DistilBERT uses exact (erf) GELU; tanh
            # approximation used here for robust Mosaic lowering (tiny numeric delta).
            out = jax.nn.gelu(out, approximate=True)
        o_ref[...] = out.astype(o_ref.dtype)


def linear(x, w, b, activation="none", out_dtype=None):
    # x: (M, K) bf16; w: (K, N) bf16; b: (1, N) f32 -> (M, N)
    M, K = x.shape
    N = w.shape[1]
    out_dtype = out_dtype or x.dtype
    tm = _tile(M, 256, 8)
    tn = _tile(N, 256, 128)          # 256-wide N: full MXU array on v6e/v7x
    tk = _tile(K, 512, 128)
    grid = (M // tm, N // tn, K // tk)
    kernel = functools.partial(_linear_kernel, activation=activation)
    return pl.pallas_call(
        kernel,
        out_shape=jax.ShapeDtypeStruct((M, N), out_dtype),
        grid=grid,
        in_specs=[
            pl.BlockSpec((tm, tk), lambda i, j, k: (i, k)),
            pl.BlockSpec((tk, tn), lambda i, j, k: (k, j)),
            pl.BlockSpec((1, tn), lambda i, j, k: (0, j)),
        ],
        out_specs=pl.BlockSpec((tm, tn), lambda i, j, k: (i, j)),
        scratch_shapes=[pltpu.VMEM((tm, tn), jnp.float32)],
        compiler_params=_cparams(("parallel", "parallel", "arbitrary")),
    )(x, w, b)


# ----------------------------------------------------------------------------
# Multi-head attention + fused output projection.
# One batch per grid step, heads sliced inside the kernel, context assembled in
# a lane-dense (S, H) VMEM scratch, then ctx @ Wo + bo written as one dense
# (S, H) slab (no split/merge-head transposes and no ctx HBM round trip).
# ----------------------------------------------------------------------------
def _attention_kernel(qkv_ref, bias_ref, wo_ref, bo_ref, o_ref, ctx_ref,
                      *, n_heads, head_dim, scale):
    H = n_heads * head_dim
    bias = bias_ref[0].astype(jnp.float32)                     # (1, S) additive mask
    for h in range(n_heads):
        lo = h * head_dim
        hi = lo + head_dim
        q = qkv_ref[0, :, lo:hi]                               # (S, Dh) bf16
        k = qkv_ref[0, :, H + lo:H + hi]                       # (S, Dh) bf16
        v = qkv_ref[0, :, 2 * H + lo:2 * H + hi]               # (S, Dh) bf16

        # scores = q @ k^T (contraction over Dh), f32 accumulate on the MXU.
        scores = jax.lax.dot_general(
            q, k, (((1,), (1,)), ((), ())),
            preferred_element_type=jnp.float32,
        ) * scale                                              # (S, S) f32
        scores = scores + bias

        m = jnp.max(scores, axis=-1, keepdims=True)
        p = jnp.exp(scores - m)
        denom = jnp.sum(p, axis=-1, keepdims=True)
        ctx = jnp.dot(p.astype(v.dtype), v,
                      preferred_element_type=jnp.float32)      # (S, Dh) f32
        ctx = ctx * pl.reciprocal(denom, approx=True)          # EUP slot, not VALU

        ctx_ref[:, lo:hi] = ctx.astype(ctx_ref.dtype)          # assemble (S, H) bf16

    # Fused output projection: (S, H) @ (H, H) + bo, f32 accumulate, one dense store.
    out = jnp.dot(ctx_ref[...], wo_ref[...], preferred_element_type=jnp.float32)
    out = out + bo_ref[...].astype(jnp.float32)
    o_ref[0] = out.astype(o_ref.dtype)
    # TODO(synk): for S >~ 1-2K convert to KV-tiled (flash-style) online softmax
    # instead of materializing the full (S, S) scores block per head.


def multi_head_attention(qkv, bias, wo, bo, n_heads, head_dim, scale):
    # qkv: (B, S, 3H) bf16; bias: (B, 1, S) f32; wo: (H, H) bf16; bo: (1, H) f32
    # -> (B, S, H) bf16 (already projected through the attention output layer).
    B, S, threeH = qkv.shape
    H = n_heads * head_dim
    kernel = functools.partial(
        _attention_kernel, n_heads=n_heads, head_dim=head_dim, scale=scale
    )
    return pl.pallas_call(
        kernel,
        out_shape=jax.ShapeDtypeStruct((B, S, H), qkv.dtype),
        grid=(B,),
        in_specs=[
            pl.BlockSpec((1, S, threeH), lambda b: (b, 0, 0)),
            pl.BlockSpec((1, 1, S), lambda b: (b, 0, 0)),
            pl.BlockSpec((H, H), lambda b: (0, 0)),     # resident across grid steps
            pl.BlockSpec((1, H), lambda b: (0, 0)),
        ],
        out_specs=pl.BlockSpec((1, S, H), lambda b: (b, 0, 0)),
        scratch_shapes=[pltpu.VMEM((S, H), COMPUTE_DTYPE)],
        compiler_params=_cparams(("parallel",)),
    )(qkv, bias, wo, bo)


# ----------------------------------------------------------------------------
# Parameter init (deterministic, synthetic). Weights stored in bf16 for the MXU;
# biases / LayerNorm params / embeddings stay f32.
# ----------------------------------------------------------------------------
def init_params(key, vocab_size, hidden, n_layers, n_heads, intermediate, max_pos):
    def nrm(k, shape, std=0.02, dtype=jnp.float32):
        return (std * jax.random.normal(k, shape, dtype=jnp.float32)).astype(dtype)

    keys = jax.random.split(key, 2 + n_layers)
    params = {
        "word_emb": nrm(keys[0], (vocab_size, hidden), std=1.0),
        "pos_emb": nrm(keys[1], (max_pos, hidden), std=1.0),
        "emb_ln_g": jnp.ones((1, hidden), jnp.float32),
        "emb_ln_b": jnp.zeros((1, hidden), jnp.float32),
        "layers": [],
    }
    for li in range(n_layers):
        lk = jax.random.split(keys[2 + li], 6)
        wq = nrm(lk[0], (hidden, hidden), dtype=MATMUL_DTYPE)
        wk = nrm(lk[1], (hidden, hidden), dtype=MATMUL_DTYPE)
        wv = nrm(lk[2], (hidden, hidden), dtype=MATMUL_DTYPE)
        layer = {
            "wqkv": jnp.concatenate([wq, wk, wv], axis=1),        # (H, 3H) fused
            "bqkv": jnp.zeros((1, 3 * hidden), jnp.float32),
            "wo": nrm(lk[3], (hidden, hidden), dtype=MATMUL_DTYPE),
            "bo": jnp.zeros((1, hidden), jnp.float32),
            "ln1_g": jnp.ones((1, hidden), jnp.float32),
            "ln1_b": jnp.zeros((1, hidden), jnp.float32),
            "w1": nrm(lk[4], (hidden, intermediate), dtype=MATMUL_DTYPE),
            "b1": jnp.zeros((1, intermediate), jnp.float32),
            "w2": nrm(lk[5], (intermediate, hidden), dtype=MATMUL_DTYPE),
            "b2": jnp.zeros((1, hidden), jnp.float32),
            "ln2_g": jnp.ones((1, hidden), jnp.float32),
            "ln2_b": jnp.zeros((1, hidden), jnp.float32),
        }
        params["layers"].append(layer)
    return params


# ----------------------------------------------------------------------------
# Model forward
# ----------------------------------------------------------------------------
@functools.partial(jax.jit, static_argnums=(3,))
def distilbert_forward(params, input_ids, attention_mask, n_heads):
    B, S = input_ids.shape
    H = params["word_emb"].shape[1]
    Dh = H // n_heads
    scale = 1.0 / math.sqrt(Dh)

    # Embedding gathers (glue, plain JAX).
    word = jnp.take(params["word_emb"], input_ids, axis=0)            # (B, S, H) f32
    pos = jnp.take(params["pos_emb"], jnp.arange(S), axis=0)          # (S, H)
    pos = jnp.broadcast_to(pos[None], (B, S, H))

    # embeddings = dropout(LayerNorm(word + pos)); dropout == identity (eval).
    hidden = add_layernorm(
        word.reshape(B * S, H), pos.reshape(B * S, H),
        params["emb_ln_g"], params["emb_ln_b"],
        out_dtype=COMPUTE_DTYPE,
    )  # (B*S, H) bf16

    # Attention mask -> additive bias (B, 1, S), shared across heads & query rows.
    if attention_mask is None:
        bias = jnp.zeros((B, 1, S), jnp.float32)
    else:
        bias = ((1.0 - attention_mask.astype(jnp.float32)) * -1e9)[:, None, :]

    for layer in params["layers"]:
        # Fused QKV projection, then per-batch attention (+ fused Wo projection)
        # on the (S, 3H) slab.
        qkv = linear(hidden, layer["wqkv"], layer["bqkv"])             # (B*S, 3H)
        attn_out = multi_head_attention(qkv.reshape(B, S, 3 * H), bias,
                                        layer["wo"], layer["bo"],
                                        n_heads, Dh, scale)            # (B, S, H)
        hidden = add_layernorm(attn_out.reshape(B * S, H), hidden,
                               layer["ln1_g"], layer["ln1_b"],
                               out_dtype=COMPUTE_DTYPE)

        # Feed-forward (GELU).
        ff = linear(hidden, layer["w1"], layer["b1"], activation="gelu")
        ff = linear(ff, layer["w2"], layer["b2"])
        hidden = add_layernorm(ff, hidden, layer["ln2_g"], layer["ln2_b"],
                               out_dtype=COMPUTE_DTYPE)

    return hidden.reshape(B, S, H).astype(jnp.float32)


# ----------------------------------------------------------------------------
if __name__ == "__main__":
    # Small synthetic configuration consistent with the module's structure.
    VOCAB = 100
    HIDDEN = 32
    N_LAYERS = 2
    N_HEADS = 4
    INTERMEDIATE = 64
    MAX_POS = 16
    B, S = 2, 8

    key = jax.random.PRNGKey(0)
    k_params, k_ids = jax.random.split(key)

    params = init_params(k_params, VOCAB, HIDDEN, N_LAYERS, N_HEADS,
                         INTERMEDIATE, MAX_POS)

    input_ids = jax.random.randint(k_ids, (B, S), 0, VOCAB, dtype=jnp.int32)
    # Mask out the last two tokens of the second sequence to exercise masking.
    attention_mask = jnp.ones((B, S), jnp.int32).at[1, -2:].set(0)

    out = distilbert_forward(params, input_ids, attention_mask, N_HEADS)
    out = jax.block_until_ready(out)

    assert out.shape == (B, S, HIDDEN)
    assert bool(jnp.all(jnp.isfinite(out)))
    print("KERNEL_OK")
</pallas_src>

<mosaic_0001>
module attributes {stable_mosaic.version = 11 : i64} {
  func.func @_add_layernorm_kernel(%arg0: i32, %arg1: memref<16x32xf32, #tpu.memory_space<vmem>>, %arg2: memref<16x32xf32, #tpu.memory_space<vmem>>, %arg3: memref<1x32xf32, #tpu.memory_space<vmem>>, %arg4: memref<1x32xf32, #tpu.memory_space<vmem>>, %arg5: memref<16x32xbf16, #tpu.memory_space<vmem>>) attributes {dimension_semantics = [#tpu.dimension_semantics<parallel>], iteration_bounds = array<i64: 1>, scalar_prefetch = 0 : i64, scratch_operands = 0 : i64, tpu.core_type = #tpu.core_type<tc>, window_params = [{transform_indices = @transform_0, window_bounds = array<i64: 16, 32>}, {transform_indices = @transform_1, window_bounds = array<i64: 16, 32>}, {pipeline_mode = #tpu.pipeline_mode<synchronous>, transform_indices = @transform_2, window_bounds = array<i64: 1, 32>}, {pipeline_mode = #tpu.pipeline_mode<synchronous>, transform_indices = @transform_3, window_bounds = array<i64: 1, 32>}, {transform_indices = @transform_4, window_bounds = array<i64: 16, 32>}]} {
    %c0 = arith.constant 0 : index
    %c0_0 = arith.constant 0 : index
    %0 = vector.load %arg1[%c0, %c0_0] : memref<16x32xf32, #tpu.memory_space<vmem>>, vector<16x32xf32>
    %c0_1 = arith.constant 0 : index
    %c0_2 = arith.constant 0 : index
    %1 = vector.load %arg2[%c0_1, %c0_2] : memref<16x32xf32, #tpu.memory_space<vmem>>, vector<16x32xf32>
    %2 = arith.addf %0, %1 : vector<16x32xf32>
    %cst = arith.constant dense<0.000000e+00> : vector<16xf32>
    %3 = vector.multi_reduction <add>, %2, %cst [1] : vector<16x32xf32> to vector<16xf32>
    %4 = vector.shape_cast %3 : vector<16xf32> to vector<16x1xf32>
    %cst_3 = arith.constant 3.200000e+01 : f32
    %5 = vector.broadcast %cst_3 : f32 to vector<16x1xf32>
    %6 = arith.divf %4, %5 : vector<16x1xf32>
    %7 = vector.broadcast %6 : vector<16x1xf32> to vector<16x32xf32>
    %8 = arith.subf %2, %7 : vector<16x32xf32>
    %9 = arith.mulf %8, %8 : vector<16x32xf32>
    %cst_4 = arith.constant dense<0.000000e+00> : vector<16xf32>
    %10 = vector.multi_reduction <add>, %9, %cst_4 [1] : vector<16x32xf32> to vector<16xf32>
    %11 = vector.shape_cast %10 : vector<16xf32> to vector<16x1xf32>
    %cst_5 = arith.constant 3.200000e+01 : f32
    %12 = vector.broadcast %cst_5 : f32 to vector<16x1xf32>
    %13 = arith.divf %11, %12 : vector<16x1xf32>
    %14 = vector.broadcast %6 : vector<16x1xf32> to vector<16x32xf32>
    %15 = arith.subf %2, %14 : vector<16x32xf32>
    %cst_6 = arith.constant 9.99999996E-13 : f32
    %16 = vector.broadcast %cst_6 : f32 to vector<16x1xf32>
    %17 = arith.addf %13, %16 : vector<16x1xf32>
    %18 = math.rsqrt %17 : vector<16x1xf32>
    %19 = vector.broadcast %18 : vector<16x1xf32> to vector<16x32xf32>
    %20 = arith.mulf %15, %19 : vector<16x32xf32>
    %c0_7 = arith.constant 0 : index
    %c0_8 = arith.constant 0 : index
    %21 = vector.load %arg3[%c0_7, %c0_8] : memref<1x32xf32, #tpu.memory_space<vmem>>, vector<1x32xf32>
    %22 = vector.broadcast %21 : vector<1x32xf32> to vector<16x32xf32>
    %23 = arith.mulf %20, %22 : vector<16x32xf32>
    %c0_9 = arith.constant 0 : index
    %c0_10 = arith.constant 0 : index
    %24 = vector.load %arg4[%c0_9, %c0_10] : memref<1x32xf32, #tpu.memory_space<vmem>>, vector<1x32xf32>
    %25 = vector.broadcast %24 : vector<1x32xf32> to vector<16x32xf32>
    %26 = arith.addf %23, %25 : vector<16x32xf32>
    %27 = arith.truncf %26 : vector<16x32xf32> to vector<16x32xbf16>
    %c0_11 = arith.constant 0 : index
    %c0_12 = arith.constant 0 : index
    %28 = vector.load %arg5[%c0_11, %c0_12] : memref<16x32xbf16, #tpu.memory_space<vmem>>, vector<16x32xbf16>
    tpu.vector_store %arg5[%c0_11, %c0_12], %27 {strides = array<i32>} : memref<16x32xbf16, #tpu.memory_space<vmem>>, vector<16x32xbf16>,
    return
  }
  func.func @transform_0(%arg0: i32) -> (i32, i32) {
    %c0_i32 = arith.constant 0 : i32
    %c0_i32_0 = arith.constant 0 : i32
    return %arg0, %c0_i32 : i32, i32
  }
  func.func @transform_1(%arg0: i32) -> (i32, i32) {
    %c0_i32 = arith.constant 0 : i32
    %c0_i32_0 = arith.constant 0 : i32
    return %arg0, %c0_i32 : i32, i32
  }
  func.func @transform_2(%arg0: i32) -> (i32, i32) {
    %c0_i32 = arith.constant 0 : i32
    %c0_i32_0 = arith.constant 0 : i32
    %c0_i32_1 = arith.constant 0 : i32
    return %c0_i32, %c0_i32_0 : i32, i32
  }
  func.func @transform_3(%arg0: i32) -> (i32, i32) {
    %c0_i32 = arith.constant 0 : i32
    %c0_i32_0 = arith.constant 0 : i32
    %c0_i32_1 = arith.constant 0 : i32
    return %c0_i32, %c0_i32_0 : i32, i32
  }
  func.func @transform_4(%arg0: i32) -> (i32, i32) {
    %c0_i32 = arith.constant 0 : i32
    %c0_i32_0 = arith.constant 0 : i32
    return %arg0, %c0_i32 : i32, i32
  }
}

module attributes {stable_mosaic.version = 11 : i64} {
  func.func @_linear_kernel(%arg0: i32, %arg1: i32, %arg2: i32, %arg3: memref<16x32xbf16, #tpu.memory_space<vmem>>, %arg4: memref<32x96xbf16, #tpu.memory_space<vmem>>, %arg5: memref<1x96xf32, #tpu.memory_space<vmem>>, %arg6: memref<16x96xbf16, #tpu.memory_space<vmem>>, %arg7: memref<16x96xf32, #tpu.memory_space<vmem>>) attributes {dimension_semantics = [#tpu.dimension_semantics<parallel>, #tpu.dimension_semantics<parallel>, #tpu.dimension_semantics<arbitrary>], iteration_bounds = array<i64: 1, 1, 1>, scalar_prefetch = 0 : i64, scratch_operands = 1 : i64, tpu.core_type = #tpu.core_type<tc>, window_params = [{transform_indices = @transform_0, window_bounds = array<i64: 16, 32>}, {transform_indices = @transform_1, window_bounds = array<i64: 32, 96>}, {transform_indices = @transform_2, window_bounds = array<i64: 1, 96>}, {transform_indices = @transform_3, window_bounds = array<i64: 16, 96>}]} {
    %c0_i32 = arith.constant 0 : i32
    %0 = arith.cmpi eq, %arg2, %c0_i32 : i32
    %1 = arith.extui %0 : i1 to i32
    %c0_i32_0 = arith.constant 0 : i32
    %2 = arith.cmpi ne, %1, %c0_i32_0 : i32
    scf.if %2 {
      %cst_10 = arith.constant 0.000000e+00 : f32
      %12 = vector.broadcast %cst_10 : f32 to vector<16x96xf32>
      %c0_11 = arith.constant 0 : index
      %c0_12 = arith.constant 0 : index
      %13 = vector.load %arg7[%c0_11, %c0_12] : memref<16x96xf32, #tpu.memory_space<vmem>>, vector<16x96xf32>
      tpu.vector_store %arg7[%c0_11, %c0_12], %12 {strides = array<i32>} : memref<16x96xf32, #tpu.memory_space<vmem>>, vector<16x96xf32>,
    } else {
    }
    %c0 = arith.constant 0 : index
    %c0_1 = arith.constant 0 : index
    %3 = vector.load %arg7[%c0, %c0_1] : memref<16x96xf32, #tpu.memory_space<vmem>>, vector<16x96xf32>
    %c0_2 = arith.constant 0 : index
    %c0_3 = arith.constant 0 : index
    %4 = vector.load %arg3[%c0_2, %c0_3] : memref<16x32xbf16, #tpu.memory_space<vmem>>, vector<16x32xbf16>
    %c0_4 = arith.constant 0 : index
    %c0_5 = arith.constant 0 : index
    %5 = vector.load %arg4[%c0_4, %c0_5] : memref<32x96xbf16, #tpu.memory_space<vmem>>, vector<32x96xbf16>
    %cst = arith.constant dense<0.000000e+00> : vector<16x96xf32>
    %6 = tpu.matmul %4, %5, %cst {dimension_numbers = #tpu.dot_dimension_numbers<[1], [0], [0], [1], [0, 0, 1, 1], [], []>} : vector<16x32xbf16>, vector<32x96xbf16>, vector<16x96xf32> -> vector<16x96xf32>
    %7 = arith.addf %3, %6 : vector<16x96xf32>
    %c0_6 = arith.constant 0 : index
    %c0_7 = arith.constant 0 : index
    %8 = vector.load %arg7[%c0_6, %c0_7] : memref<16x96xf32, #tpu.memory_space<vmem>>, vector<16x96xf32>
    tpu.vector_store %arg7[%c0_6, %c0_7], %7 {strides = array<i32>} : memref<16x96xf32, #tpu.memory_space<vmem>>, vector<16x96xf32>,
    %c0_i32_8 = arith.constant 0 : i32
    %9 = arith.cmpi eq, %arg2, %c0_i32_8 : i32
    %10 = arith.extui %9 : i1 to i32
    %c0_i32_9 = arith.constant 0 : i32
    %11 = arith.cmpi ne, %10, %c0_i32_9 : i32
    scf.if %11 {
      %c0_10 = arith.constant 0 : index
      %c0_11 = arith.constant 0 : index
      %12 = vector.load %arg7[%c0_10, %c0_11] : memref<16x96xf32, #tpu.memory_space<vmem>>, vector<16x96xf32>
      %c0_12 = arith.constant 0 : index
      %c0_13 = arith.constant 0 : index
      %13 = vector.load %arg5[%c0_12, %c0_13] : memref<1x96xf32, #tpu.memory_space<vmem>>, vector<1x96xf32>
      %14 = vector.broadcast %13 : vector<1x96xf32> to vector<16x96xf32>
      %15 = arith.addf %12, %14 : vector<16x96xf32>
      %16 = arith.truncf %15 : vector<16x96xf32> to vector<16x96xbf16>
      %c0_14 = arith.constant 0 : index
      %c0_15 = arith.constant 0 : index
      %17 = vector.load %arg6[%c0_14, %c0_15] : memref<16x96xbf16, #tpu.memory_space<vmem>>, vector<16x96xbf16>
      tpu.vector_store %arg6[%c0_14, %c0_15], %16 {strides = array<i32>} : memref<16x96xbf16, #tpu.memory_space<vmem>>, vector<16x96xbf16>,
    } else {
    }
    return
  }
  func.func @transform_0(%arg0: i32, %arg1: i32, %arg2: i32) -> (i32, i32) {
    %c0_i32 = arith.constant 0 : i32
    return %arg0, %arg2 : i32, i32
  }
  func.func @transform_1(%arg0: i32, %arg1: i32, %arg2: i32) -> (i32, i32) {
    %c0_i32 = arith.constant 0 : i32
    return %arg2, %arg1 : i32, i32
  }
  func.func @transform_2(%arg0: i32, %arg1: i32, %arg2: i32) -> (i32, i32) {
    %c0_i32 = arith.constant 0 : i32
    %c0_i32_0 = arith.constant 0 : i32
    return %c0_i32, %arg1 : i32, i32
  }
  func.func @transform_3(%arg0: i32, %arg1: i32, %arg2: i32) -> (i32, i32) {
    %c0_i32 = arith.constant 0 : i32
    return %arg0, %arg1 : i32, i32
  }
}

module attributes {stable_mosaic.version = 11 : i64} {
  func.func @_add_layernorm_kernel(%arg0: i32, %arg1: memref<16x32xbf16, #tpu.memory_space<vmem>>, %arg2: memref<16x32xbf16, #tpu.memory_space<vmem>>, %arg3: memref<1x32xf32, #tpu.memory_space<vmem>>, %arg4: memref<1x32xf32, #tpu.memory_space<vmem>>, %arg5: memref<16x32xbf16, #tpu.memory_space<vmem>>) attributes {dimension_semantics = [#tpu.dimension_semantics<parallel>], iteration_bounds = array<i64: 1>, scalar_prefetch = 0 : i64, scratch_operands = 0 : i64, tpu.core_type = #tpu.core_type<tc>, window_params = [{transform_indices = @transform_0, window_bounds = array<i64: 16, 32>}, {transform_indices = @transform_1, window_bounds = array<i64: 16, 32>}, {pipeline_mode = #tpu.pipeline_mode<synchronous>, transform_indices = @transform_2, window_bounds = array<i64: 1, 32>}, {pipeline_mode = #tpu.pipeline_mode<synchronous>, transform_indices = @transform_3, window_bounds = array<i64: 1, 32>}, {transform_indices = @transform_4, window_bounds = array<i64: 16, 32>}]} {
    %c0 = arith.constant 0 : index
    %c0_0 = arith.constant 0 : index
    %0 = vector.load %arg1[%c0, %c0_0] : memref<16x32xbf16, #tpu.memory_space<vmem>>, vector<16x32xbf16>
    %1 = arith.extf %0 : vector<16x32xbf16> to vector<16x32xf32>
    %c0_1 = arith.constant 0 : index
    %c0_2 = arith.constant 0 : index
    %2 = vector.load %arg2[%c0_1, %c0_2] : memref<16x32xbf16, #tpu.memory_space<vmem>>, vector<16x32xbf16>
    %3 = arith.extf %2 : vector<16x32xbf16> to vector<16x32xf32>
    %4 = arith.addf %1, %3 : vector<16x32xf32>
    %cst = arith.constant dense<0.000000e+00> : vector<16xf32>
    %5 = vector.multi_reduction <add>, %4, %cst [1] : vector<16x32xf32> to vector<16xf32>
    %6 = vector.shape_cast %5 : vector<16xf32> to vector<16x1xf32>
    %cst_3 = arith.constant 3.200000e+01 : f32
    %7 = vector.broadcast %cst_3 : f32 to vector<16x1xf32>
    %8 = arith.divf %6, %7 : vector<16x1xf32>
    %9 = vector.broadcast %8 : vector<16x1xf32> to vector<16x32xf32>
    %10 = arith.subf %4, %9 : vector<16x32xf32>
    %11 = arith.mulf %10, %10 : vector<16x32xf32>
    %cst_4 = arith.constant dense<0.000000e+00> : vector<16xf32>
    %12 = vector.multi_reduction <add>, %11, %cst_4 [1] : vector<16x32xf32> to vector<16xf32>
    %13 = vector.shape_cast %12 : vector<16xf32> to vector<16x1xf32>
    %cst_5 = arith.constant 3.200000e+01 : f32
    %14 = vector.broadcast %cst_5 : f32 to vector<16x1xf32>
    %15 = arith.divf %13, %14 : vector<16x1xf32>
    %16 = vector.broadcast %8 : vector<16x1xf32> to vector<16x32xf32>
    %17 = arith.subf %4, %16 : vector<16x32xf32>
    %cst_6 = arith.constant 9.99999996E-13 : f32
    %18 = vector.broadcast %cst_6 : f32 to vector<16x1xf32>
    %19 = arith.addf %15, %18 : vector<16x1xf32>
    %20 = math.rsqrt %19 : vector<16x1xf32>
    %21 = vector.broadcast %20 : vector<16x1xf32> to vector<16x32xf32>
    %22 = arith.mulf %17, %21 : vector<16x32xf32>
    %c0_7 = arith.constant 0 : index
    %c0_8 = arith.constant 0 : index
    %23 = vector.load %arg3[%c0_7, %c0_8] : memref<1x32xf32, #tpu.memory_space<vmem>>, vector<1x32xf32>
    %24 = vector.broadcast %23 : vector<1x32xf32> to vector<16x32xf32>
    %25 = arith.mulf %22, %24 : vector<16x32xf32>
    %c0_9 = arith.constant 0 : index
    %c0_10 = arith.constant 0 : index
    %26 = vector.load %arg4[%c0_9, %c0_10] : memref<1x32xf32, #tpu.memory_space<vmem>>, vector<1x32xf32>
    %27 = vector.broadcast %26 : vector<1x32xf32> to vector<16x32xf32>
    %28 = arith.addf %25, %27 : vector<16x32xf32>
    %29 = arith.truncf %28 : vector<16x32xf32> to vector<16x32xbf16>
    %c0_11 = arith.constant 0 : index
    %c0_12 = arith.constant 0 : index
    %30 = vector.load %arg5[%c0_11, %c0_12] : memref<16x32xbf16, #tpu.memory_space<vmem>>, vector<16x32xbf16>
    tpu.vector_store %arg5[%c0_11, %c0_12], %29 {strides = array<i32>} : memref<16x32xbf16, #tpu.memory_space<vmem>>, vector<16x32xbf16>,
    return
  }
  func.func @transform_0(%arg0: i32) -> (i32, i32) {
    %c0_i32 = arith.constant 0 : i32
    %c0_i32_0 = arith.constant 0 : i32
    return %arg0, %c0_i32 : i32, i32
  }
  func.func @transform_1(%arg0: i32) -> (i32, i32) {
    %c0_i32 = arith.constant 0 : i32
    %c0_i32_0 = arith.constant 0 : i32
    return %arg0, %c0_i32 : i32, i32
  }
  func.func @transform_2(%arg0: i32) -> (i32, i32) {
    %c0_i32 = arith.constant 0 : i32
    %c0_i32_0 = arith.constant 0 : i32
    %c0_i32_1 = arith.constant 0 : i32
    return %c0_i32, %c0_i32_0 : i32, i32
  }
  func.func @transform_3(%arg0: i32) -> (i32, i32) {
    %c0_i32 = arith.constant 0 : i32
    %c0_i32_0 = arith.constant 0 : i32
    %c0_i32_1 = arith.constant 0 : i32
    return %c0_i32, %c0_i32_0 : i32, i32
  }
  func.func @transform_4(%arg0: i32) -> (i32, i32) {
    %c0_i32 = arith.constant 0 : i32
    %c0_i32_0 = arith.constant 0 : i32
    return %arg0, %c0_i32 : i32, i32
  }
}

module attributes {stable_mosaic.version = 11 : i64} {
  func.func @_attention_kernel(%arg0: i32, %arg1: memref<1x8x96xbf16, #tpu.memory_space<vmem>>, %arg2: memref<1x1x8xf32, #tpu.memory_space<vmem>>, %arg3: memref<32x32xbf16, #tpu.memory_space<vmem>>, %arg4: memref<1x32xf32, #tpu.memory_space<vmem>>, %arg5: memref<1x8x32xbf16, #tpu.memory_space<vmem>>, %arg6: memref<8x32xbf16, #tpu.memory_space<vmem>>) attributes {dimension_semantics = [#tpu.dimension_semantics<parallel>], iteration_bounds = array<i64: 2>, scalar_prefetch = 0 : i64, scratch_operands = 1 : i64, tpu.core_type = #tpu.core_type<tc>, window_params = [{transform_indices = @transform_0, window_bounds = array<i64: 1, 8, 96>}, {transform_indices = @transform_1, window_bounds = array<i64: 1, 1, 8>}, {pipeline_mode = #tpu.pipeline_mode<synchronous>, transform_indices = @transform_2, window_bounds = array<i64: 32, 32>}, {pipeline_mode = #tpu.pipeline_mode<synchronous>, transform_indices = @transform_3, window_bounds = array<i64: 1, 32>}, {transform_indices = @transform_4, window_bounds = array<i64: 1, 8, 32>}]} {
    %c0 = arith.constant 0 : index
    %c0_0 = arith.constant 0 : index
    %c0_1 = arith.constant 0 : index
    %0 = vector.load %arg2[%c0, %c0_0, %c0_1] : memref<1x1x8xf32, #tpu.memory_space<vmem>>, vector<1x1x8xf32>
    %1 = vector.shape_cast %0 : vector<1x1x8xf32> to vector<1x8xf32>
    %c0_2 = arith.constant 0 : index
    %c0_3 = arith.constant 0 : index
    %c0_4 = arith.constant 0 : index
    %2 = vector.load %arg1[%c0_2, %c0_3, %c0_4] : memref<1x8x96xbf16, #tpu.memory_space<vmem>>, vector<1x8x8xbf16>
    %3 = vector.shape_cast %2 : vector<1x8x8xbf16> to vector<8x8xbf16>
    %c0_5 = arith.constant 0 : index
    %c0_6 = arith.constant 0 : index
    %c32 = arith.constant 32 : index
    %4 = vector.load %arg1[%c0_5, %c0_6, %c32] : memref<1x8x96xbf16, #tpu.memory_space<vmem>>, vector<1x8x8xbf16>
    %5 = vector.shape_cast %4 : vector<1x8x8xbf16> to vector<8x8xbf16>
    %c0_7 = arith.constant 0 : index
    %c0_8 = arith.constant 0 : index
    %c64 = arith.constant 64 : index
    %6 = vector.load %arg1[%c0_7, %c0_8, %c64] : memref<1x8x96xbf16, #tpu.memory_space<vmem>>, vector<1x8x8xbf16>
    %7 = vector.shape_cast %6 : vector<1x8x8xbf16> to vector<8x8xbf16>
    %cst = arith.constant dense<0.000000e+00> : vector<8x8xf32>
    %8 = tpu.matmul %3, %5, %cst {dimension_numbers = #tpu.dot_dimension_numbers<[1], [1], [0], [0], [0, 0, 1, 0], [], []>} : vector<8x8xbf16>, vector<8x8xbf16>, vector<8x8xf32> -> vector<8x8xf32>
    %cst_9 = arith.constant 0.353553385 : f32
    %9 = vector.broadcast %cst_9 : f32 to vector<8x8xf32>
    %10 = arith.mulf %8, %9 : vector<8x8xf32>
    %11 = vector.broadcast %1 : vector<1x8xf32> to vector<8x8xf32>
    %12 = arith.addf %10, %11 : vector<8x8xf32>
    %cst_10 = arith.constant dense<0xFF800000> : vector<8xf32>
    %13 = vector.multi_reduction <maximumf>, %12, %cst_10 [1] : vector<8x8xf32> to vector<8xf32>
    %14 = vector.shape_cast %13 : vector<8xf32> to vector<8x1xf32>
    %15 = vector.broadcast %14 : vector<8x1xf32> to vector<8x8xf32>
    %16 = arith.subf %12, %15 : vector<8x8xf32>
    %17 = math.exp %16 : vector<8x8xf32>
    %cst_11 = arith.constant dense<0.000000e+00> : vector<8xf32>
    %18 = vector.multi_reduction <add>, %17, %cst_11 [1] : vector<8x8xf32> to vector<8xf32>
    %19 = vector.shape_cast %18 : vector<8xf32> to vector<8x1xf32>
    %20 = arith.truncf %17 : vector<8x8xf32> to vector<8x8xbf16>
    %cst_12 = arith.constant dense<0.000000e+00> : vector<8x8xf32>
    %21 = tpu.matmul %20, %7, %cst_12 {dimension_numbers = #tpu.dot_dimension_numbers<[1], [0], [0], [1], [0, 0, 1, 1], [], []>} : vector<8x8xbf16>, vector<8x8xbf16>, vector<8x8xf32> -> vector<8x8xf32>
    %22 = tpu.reciprocal %19 {approx = true} : vector<8x1xf32> -> vector<8x1xf32>
    %23 = vector.broadcast %22 : vector<8x1xf32> to vector<8x8xf32>
    %24 = arith.mulf %21, %23 : vector<8x8xf32>
    %25 = arith.truncf %24 : vector<8x8xf32> to vector<8x8xbf16>
    %c0_13 = arith.constant 0 : index
    %c0_14 = arith.constant 0 : index
    %26 = vector.load %arg6[%c0_13, %c0_14] : memref<8x32xbf16, #tpu.memory_space<vmem>>, vector<8x8xbf16>
    tpu.vector_store %arg6[%c0_13, %c0_14], %25 {strides = array<i32>} : memref<8x32xbf16, #tpu.memory_space<vmem>>, vector<8x8xbf16>,
    %c0_15 = arith.constant 0 : index
    %c0_16 = arith.constant 0 : index
    %c8 = arith.constant 8 : index
    %27 = vector.load %arg1[%c0_15, %c0_16, %c8] : memref<1x8x96xbf16, #tpu.memory_space<vmem>>, vector<1x8x8xbf16>
    %28 = vector.shape_cast %27 : vector<1x8x8xbf16> to vector<8x8xbf16>
    %c0_17 = arith.constant 0 : index
    %c0_18 = arith.constant 0 : index
    %c40 = arith.constant 40 : index
    %29 = vector.load %arg1[%c0_17, %c0_18, %c40] : memref<1x8x96xbf16, #tpu.memory_space<vmem>>, vector<1x8x8xbf16>
    %30 = vector.shape_cast %29 : vector<1x8x8xbf16> to vector<8x8xbf16>
    %c0_19 = arith.constant 0 : index
    %c0_20 = arith.constant 0 : index
    %c72 = arith.constant 72 : index
    %31 = vector.load %arg1[%c0_19, %c0_20, %c72] : memref<1x8x96xbf16, #tpu.memory_space<vmem>>, vector<1x8x8xbf16>
    %32 = vector.shape_cast %31 : vector<1x8x8xbf16> to vector<8x8xbf16>
    %cst_21 = arith.constant dense<0.000000e+00> : vector<8x8xf32>
    %33 = tpu.matmul %28, %30, %cst_21 {dimension_numbers = #tpu.dot_dimension_numbers<[1], [1], [0], [0], [0, 0, 1, 0], [], []>} : vector<8x8xbf16>, vector<8x8xbf16>, vector<8x8xf32> -> vector<8x8xf32>
    %cst_22 = arith.constant 0.353553385 : f32
    %34 = vector.broadcast %cst_22 : f32 to vector<8x8xf32>
    %35 = arith.mulf %33, %34 : vector<8x8xf32>
    %36 = vector.broadcast %1 : vector<1x8xf32> to vector<8x8xf32>
    %37 = arith.addf %35, %36 : vector<8x8xf32>
    %cst_23 = arith.constant dense<0xFF800000> : vector<8xf32>
    %38 = vector.multi_reduction <maximumf>, %37, %cst_23 [1] : vector<8x8xf32> to vector<8xf32>
    %39 = vector.shape_cast %38 : vector<8xf32> to vector<8x1xf32>
    %40 = vector.broadcast %39 : vector<8x1xf32> to vector<8x8xf32>
    %41 = arith.subf %37, %40 : vector<8x8xf32>
    %42 = math.exp %41 : vector<8x8xf32>
    %cst_24 = arith.constant dense<0.000000e+00> : vector<8xf32>
    %43 = vector.multi_reduction <add>, %42, %cst_24 [1] : vector<8x8xf32> to vector<8xf32>
    %44 = vector.shape_cast %43 : vector<8xf32> to vector<8x1xf32>
    %45 = arith.truncf %42 : vector<8x8xf32> to vector<8x8xbf16>
    %cst_25 = arith.constant dense<0.000000e+00> : vector<8x8xf32>
    %46 = tpu.matmul %45, %32, %cst_25 {dimension_numbers = #tpu.dot_dimension_numbers<[1], [0], [0], [1], [0, 0, 1, 1], [], []>} : vector<8x8xbf16>, vector<8x8xbf16>, vector<8x8xf32> -> vector<8x8xf32>
    %47 = tpu.reciprocal %44 {approx = true} : vector<8x1xf32> -> vector<8x1xf32>
    %48 = vector.broadcast %47 : vector<8x1xf32> to vector<8x8xf32>
    %49 = arith.mulf %46, %48 : vector<8x8xf32>
    %50 = arith.truncf %49 : vector<8x8xf32> to vector<8x8xbf16>
    %c0_26 = arith.constant 0 : index
    %c8_27 = arith.constant 8 : index
    %51 = vector.load %arg6[%c0_26, %c8_27] : memref<8x32xbf16, #tpu.memory_space<vmem>>, vector<8x8xbf16>
    tpu.vector_store %arg6[%c0_26, %c8_27], %50 {strides = array<i32>} : memref<8x32xbf16, #tpu.memory_space<vmem>>, vector<8x8xbf16>,
    %c0_28 = arith.constant 0 : index
    %c0_29 = arith.constant 0 : index
    %c16 = arith.constant 16 : index
    %52 = vector.load %arg1[%c0_28, %c0_29, %c16] : memref<1x8x96xbf16, #tpu.memory_space<vmem>>, vector<1x8x8xbf16>
    %53 = vector.shape_cast %52 : vector<1x8x8xbf16> to vector<8x8xbf16>
    %c0_30 = arith.constant 0 : index
    %c0_31 = arith.constant 0 : index
    %c48 = arith.constant 48 : index
    %54 = vector.load %arg1[%c0_30, %c0_31, %c48] : memref<1x8x96xbf16, #tpu.memory_space<vmem>>, vector<1x8x8xbf16>
    %55 = vector.shape_cast %54 : vector<1x8x8xbf16> to vector<8x8xbf16>
    %c0_32 = arith.constant 0 : index
    %c0_33 = arith.constant 0 : index
    %c80 = arith.constant 80 : index
    %56 = vector.load %arg1[%c0_32, %c0_33, %c80] : memref<1x8x96xbf16, #tpu.memory_space<vmem>>, vector<1x8x8xbf16>
    %57 = vector.shape_cast %56 : vector<1x8x8xbf16> to vector<8x8xbf16>
    %cst_34 = arith.constant dense<0.000000e+00> : vector<8x8xf32>
    %58 = tpu.matmul %53, %55, %cst_34 {dimension_numbers = #tpu.dot_dimension_numbers<[1], [1], [0], [0], [0, 0, 1, 0], [], []>} : vector<8x8xbf16>, vector<8x8xbf16>, vector<8x8xf32> -> vector<8x8xf32>
    %cst_35 = arith.constant 0.353553385 : f32
    %59 = vector.broadcast %cst_35 : f32 to vector<8x8xf32>
    %60 = arith.mulf %58, %59 : vector<8x8xf32>
    %61 = vector.broadcast %1 : vector<1x8xf32> to vector<8x8xf32>
    %62 = arith.addf %60, %61 : vector<8x8xf32>
    %cst_36 = arith.constant dense<0xFF800000> : vector<8xf32>
    %63 = vector.multi_reduction <maximumf>, %62, %cst_36 [1] : vector<8x8xf32> to vector<8xf32>
    %64 = vector.shape_cast %63 : vector<8xf32> to vector<8x1xf32>
    %65 = vector.broadcast %64 : vector<8x1xf32> to vector<8x8xf32>
    %66 = arith.subf %62, %65 : vector<8x8xf32>
    %67 = math.exp %66 : vector<8x8xf32>
    %cst_37 = arith.constant dense<0.000000e+00> : vector<8xf32>
    %68 = vector.multi_reduction <add>, %67, %cst_37 [1] : vector<8x8xf32> to vector<8xf32>
    %69 = vector.shape_cast %68 : vector<8xf32> to vector<8x1xf32>
    %70 = arith.truncf %67 : vector<8x8xf32> to vector<8x8xbf16>
    %cst_38 = arith.constant dense<0.000000e+00> : vector<8x8xf32>
    %71 = tpu.matmul %70, %57, %cst_38 {dimension_numbers = #tpu.dot_dimension_numbers<[1], [0], [0], [1], [0, 0, 1, 1], [], []>} : vector<8x8xbf16>, vector<8x8xbf16>, vector<8x8xf32> -> vector<8x8xf32>
    %72 = tpu.reciprocal %69 {approx = true} : vector<8x1xf32> -> vector<8x1xf32>
    %73 = vector.broadcast %72 : vector<8x1xf32> to vector<8x8xf32>
    %74 = arith.mulf %71, %73 : vector<8x8xf32>
    %75 = arith.truncf %74 : vector<8x8xf32> to vector<8x8xbf16>
    %c0_39 = arith.constant 0 : index
    %c16_40 = arith.constant 16 : index
    %76 = vector.load %arg6[%c0_39, %c16_40] : memref<8x32xbf16, #tpu.memory_space<vmem>>, vector<8x8xbf16>
    tpu.vector_store %arg6[%c0_39, %c16_40], %75 {strides = array<i32>} : memref<8x32xbf16, #tpu.memory_space<vmem>>, vector<8x8xbf16>,
    %c0_41 = arith.constant 0 : index
    %c0_42 = arith.constant 0 : index
    %c24 = arith.constant 24 : index
    %77 = vector.load %arg1[%c0_41, %c0_42, %c24] : memref<1x8x96xbf16, #tpu.memory_space<vmem>>, vector<1x8x8xbf16>
    %78 = vector.shape_cast %77 : vector<1x8x8xbf16> to vector<8x8xbf16>
    %c0_43 = arith.constant 0 : index
    %c0_44 = arith.constant 0 : index
    %c56 = arith.constant 56 : index
    %79 = vector.load %arg1[%c0_43, %c0_44, %c56] : memref<1x8x96xbf16, #tpu.memory_space<vmem>>, vector<1x8x8xbf16>
    %80 = vector.shape_cast %79 : vector<1x8x8xbf16> to vector<8x8xbf16>
    %c0_45 = arith.constant 0 : index
    %c0_46 = arith.constant 0 : index
    %c88 = arith.constant 88 : index
    %81 = vector.load %arg1[%c0_45, %c0_46, %c88] : memref<1x8x96xbf16, #tpu.memory_space<vmem>>, vector<1x8x8xbf16>
    %82 = vector.shape_cast %81 : vector<1x8x8xbf16> to vector<8x8xbf16>
    %cst_47 = arith.constant dense<0.000000e+00> : vector<8x8xf32>
    %83 = tpu.matmul %78, %80, %cst_47 {dimension_numbers = #tpu.dot_dimension_numbers<[1], [1], [0], [0], [0, 0, 1, 0], [], []>} : vector<8x8xbf16>, vector<8x8xbf16>, vector<8x8xf32> -> vector<8x8xf32>
    %cst_48 = arith.constant 0.353553385 : f32
    %84 = vector.broadcast %cst_48 : f32 to vector<8x8xf32>
    %85 = arith.mulf %83, %84 : vector<8x8xf32>
    %86 = vector.broadcast %1 : vector<1x8xf32> to vector<8x8xf32>
    %87 = arith.addf %85, %86 : vector<8x8xf32>
    %cst_49 = arith.constant dense<0xFF800000> : vector<8xf32>
    %88 = vector.multi_reduction <maximumf>, %87, %cst_49 [1] : vector<8x8xf32> to vector<8xf32>
    %89 = vector.shape_cast %88 : vector<8xf32> to vector<8x1xf32>
    %90 = vector.broadcast %89 : vector<8x1xf32> to vector<8x8xf32>
    %91 = arith.subf %87, %90 : vector<8x8xf32>
    %92 = math.exp %91 : vector<8x8xf32>
    %cst_50 = arith.constant dense<0.000000e+00> : vector<8xf32>
    %93 = vector.multi_reduction <add>, %92, %cst_50 [1] : vector<8x8xf32> to vector<8xf32>
    %94 = vector.shape_cast %93 : vector<8xf32> to vector<8x1xf32>
    %95 = arith.truncf %92 : vector<8x8xf32> to vector<8x8xbf16>
    %cst_51 = arith.constant dense<0.000000e+00> : vector<8x8xf32>
    %96 = tpu.matmul %95, %82, %cst_51 {dimension_numbers = #tpu.dot_dimension_numbers<[1], [0], [0], [1], [0, 0, 1, 1], [], []>} : vector<8x8xbf16>, vector<8x8xbf16>, vector<8x8xf32> -> vector<8x8xf32>
    %97 = tpu.reciprocal %94 {approx = true} : vector<8x1xf32> -> vector<8x1xf32>
    %98 = vector.broadcast %97 : vector<8x1xf32> to vector<8x8xf32>
    %99 = arith.mulf %96, %98 : vector<8x8xf32>
    %100 = arith.truncf %99 : vector<8x8xf32> to vector<8x8xbf16>
    %c0_52 = arith.constant 0 : index
    %c24_53 = arith.constant 24 : index
    %101 = vector.load %arg6[%c0_52, %c24_53] : memref<8x32xbf16, #tpu.memory_space<vmem>>, vector<8x8xbf16>
    tpu.vector_store %arg6[%c0_52, %c24_53], %100 {strides = array<i32>} : memref<8x32xbf16, #tpu.memory_space<vmem>>, vector<8x8xbf16>,
    %c0_54 = arith.constant 0 : index
    %c0_55 = arith.constant 0 : index
    %102 = vector.load %arg6[%c0_54, %c0_55] : memref<8x32xbf16, #tpu.memory_space<vmem>>, vector<8x32xbf16>
    %c0_56 = arith.constant 0 : index
    %c0_57 = arith.constant 0 : index
    %103 = vector.load %arg3[%c0_56, %c0_57] : memref<32x32xbf16, #tpu.memory_space<vmem>>, vector<32x32xbf16>
    %cst_58 = arith.constant dense<0.000000e+00> : vector<8x32xf32>
    %104 = tpu.matmul %102, %103, %cst_58 {dimension_numbers = #tpu.dot_dimension_numbers<[1], [0], [0], [1], [0, 0, 1, 1], [], []>} : vector<8x32xbf16>, vector<32x32xbf16>, vector<8x32xf32> -> vector<8x32xf32>
    %c0_59 = arith.constant 0 : index
    %c0_60 = arith.constant 0 : index
    %105 = vector.load %arg4[%c0_59, %c0_60] : memref<1x32xf32, #tpu.memory_space<vmem>>, vector<1x32xf32>
    %106 = vector.broadcast %105 : vector<1x32xf32> to vector<8x32xf32>
    %107 = arith.addf %104, %106 : vector<8x32xf32>
    %108 = arith.truncf %107 : vector<8x32xf32> to vector<8x32xbf16>
    %c0_61 = arith.constant 0 : index
    %c0_62 = arith.constant 0 : index
    %c0_63 = arith.constant 0 : index
    %109 = vector.load %arg5[%c0_61, %c0_62, %c0_63] : memref<1x8x32xbf16, #tpu.memory_space<vmem>>, vector<1x8x32xbf16>
    %110 = vector.shape_cast %109 : vector<1x8x32xbf16> to vector<8x32xbf16>
    %111 = vector.shape_cast %108 : vector<8x32xbf16> to vector<1x8x32xbf16>
    tpu.vector_store %arg5[%c0_61, %c0_62, %c0_63], %111 {strides = array<i32>} : memref<1x8x32xbf16, #tpu.memory_space<vmem>>, vector<1x8x32xbf16>,
    return
  }
  func.func @transform_0(%arg0: i32) -> (i32, i32, i32) {
    %c0_i32 = arith.constant 0 : i32
    %c0_i32_0 = arith.constant 0 : i32
    %c0_i32_1 = arith.constant 0 : i32
    return %arg0, %c0_i32, %c0_i32_0 : i32, i32, i32
  }
  func.func @transform_1(%arg0: i32) -> (i32, i32, i32) {
    %c0_i32 = arith.constant 0 : i32
    %c0_i32_0 = arith.constant 0 : i32
    %c0_i32_1 = arith.constant 0 : i32
    return %arg0, %c0_i32, %c0_i32_0 : i32, i32, i32
  }
  func.func @transform_2(%arg0: i32) -> (i32, i32) {
    %c0_i32 = arith.constant 0 : i32
    %c0_i32_0 = arith.constant 0 : i32
    %c0_i32_1 = arith.constant 0 : i32
    return %c0_i32, %c0_i32_0 : i32, i32
  }
  func.func @transform_3(%arg0: i32) -> (i32, i32) {
    %c0_i32 = arith.constant 0 : i32
    %c0_i32_0 = arith.constant 0 : i32
    %c0_i32_1 = arith.constant 0 : i32
    return %c0_i32, %c0_i32_0 : i32, i32
  }
  func.func @transform_4(%arg0: i32) -> (i32, i32, i32) {
    %c0_i32 = arith.constant 0 : i32
    %c0_i32_0 = arith.constant 0 : i32
    %c0_i32_1 = arith.constant 0 : i32
    return %arg0, %c0_i32, %c0_i32_0 : i32, i32, i32
  }
}

module attributes {stable_mosaic.version = 11 : i64} {
  func.func @_linear_kernel(%arg0: i32, %arg1: i32, %arg2: i32, %arg3: memref<16x32xbf16, #tpu.memory_space<vmem>>, %arg4: memref<32x64xbf16, #tpu.memory_space<vmem>>, %arg5: memref<1x64xf32, #tpu.memory_space<vmem>>, %arg6: memref<16x64xbf16, #tpu.memory_space<vmem>>, %arg7: memref<16x64xf32, #tpu.memory_space<vmem>>) attributes {dimension_semantics = [#tpu.dimension_semantics<parallel>, #tpu.dimension_semantics<parallel>, #tpu.dimension_semantics<arbitrary>], iteration_bounds = array<i64: 1, 1, 1>, scalar_prefetch = 0 : i64, scratch_operands = 1 : i64, tpu.core_type = #tpu.core_type<tc>, window_params = [{transform_indices = @transform_0, window_bounds = array<i64: 16, 32>}, {transform_indices = @transform_1, window_bounds = array<i64: 32, 64>}, {transform_indices = @transform_2, window_bounds = array<i64: 1, 64>}, {transform_indices = @transform_3, window_bounds = array<i64: 16, 64>}]} {
    %c0_i32 = arith.constant 0 : i32
    %0 = arith.cmpi eq, %arg2, %c0_i32 : i32
    %1 = arith.extui %0 : i1 to i32
    %c0_i32_0 = arith.constant 0 : i32
    %2 = arith.cmpi ne, %1, %c0_i32_0 : i32
    scf.if %2 {
      %cst_10 = arith.constant 0.000000e+00 : f32
      %12 = vector.broadcast %cst_10 : f32 to vector<16x64xf32>
      %c0_11 = arith.constant 0 : index
      %c0_12 = arith.constant 0 : index
      %13 = vector.load %arg7[%c0_11, %c0_12] : memref<16x64xf32, #tpu.memory_space<vmem>>, vector<16x64xf32>
      tpu.vector_store %arg7[%c0_11, %c0_12], %12 {strides = array<i32>} : memref<16x64xf32, #tpu.memory_space<vmem>>, vector<16x64xf32>,
    } else {
    }
    %c0 = arith.constant 0 : index
    %c0_1 = arith.constant 0 : index
    %3 = vector.load %arg7[%c0, %c0_1] : memref<16x64xf32, #tpu.memory_space<vmem>>, vector<16x64xf32>
    %c0_2 = arith.constant 0 : index
    %c0_3 = arith.constant 0 : index
    %4 = vector.load %arg3[%c0_2, %c0_3] : memref<16x32xbf16, #tpu.memory_space<vmem>>, vector<16x32xbf16>
    %c0_4 = arith.constant 0 : index
    %c0_5 = arith.constant 0 : index
    %5 = vector.load %arg4[%c0_4, %c0_5] : memref<32x64xbf16, #tpu.memory_space<vmem>>, vector<32x64xbf16>
    %cst = arith.constant dense<0.000000e+00> : vector<16x64xf32>
    %6 = tpu.matmul %4, %5, %cst {dimension_numbers = #tpu.dot_dimension_numbers<[1], [0], [0], [1], [0, 0, 1, 1], [], []>} : vector<16x32xbf16>, vector<32x64xbf16>, vector<16x64xf32> -> vector<16x64xf32>
    %7 = arith.addf %3, %6 : vector<16x64xf32>
    %c0_6 = arith.constant 0 : index
    %c0_7 = arith.constant 0 : index
    %8 = vector.load %arg7[%c0_6, %c0_7] : memref<16x64xf32, #tpu.memory_space<vmem>>, vector<16x64xf32>
    tpu.vector_store %arg7[%c0_6, %c0_7], %7 {strides = array<i32>} : memref<16x64xf32, #tpu.memory_space<vmem>>, vector<16x64xf32>,
    %c0_i32_8 = arith.constant 0 : i32
    %9 = arith.cmpi eq, %arg2, %c0_i32_8 : i32
    %10 = arith.extui %9 : i1 to i32
    %c0_i32_9 = arith.constant 0 : i32
    %11 = arith.cmpi ne, %10, %c0_i32_9 : i32
    scf.if %11 {
      %c0_10 = arith.constant 0 : index
      %c0_11 = arith.constant 0 : index
      %12 = vector.load %arg7[%c0_10, %c0_11] : memref<16x64xf32, #tpu.memory_space<vmem>>, vector<16x64xf32>
      %c0_12 = arith.constant 0 : index
      %c0_13 = arith.constant 0 : index
      %13 = vector.load %arg5[%c0_12, %c0_13] : memref<1x64xf32, #tpu.memory_space<vmem>>, vector<1x64xf32>
      %14 = vector.broadcast %13 : vector<1x64xf32> to vector<16x64xf32>
      %15 = arith.addf %12, %14 : vector<16x64xf32>
      %16 = arith.mulf %15, %15 : vector<16x64xf32>
      %17 = arith.mulf %15, %16 : vector<16x64xf32>
      %cst_14 = arith.constant 4.471500e-02 : f32
      %18 = vector.broadcast %cst_14 : f32 to vector<16x64xf32>
      %19 = arith.mulf %18, %17 : vector<16x64xf32>
      %20 = arith.addf %15, %19 : vector<16x64xf32>
      %cst_15 = arith.constant 0.797884583 : f32
      %21 = vector.broadcast %cst_15 : f32 to vector<16x64xf32>
      %22 = arith.mulf %21, %20 : vector<16x64xf32>
      %23 = math.tanh %22 : vector<16x64xf32>
      %cst_16 = arith.constant 1.000000e+00 : f32
      %24 = vector.broadcast %cst_16 : f32 to vector<16x64xf32>
      %25 = arith.addf %24, %23 : vector<16x64xf32>
      %cst_17 = arith.constant 5.000000e-01 : f32
      %26 = vector.broadcast %cst_17 : f32 to vector<16x64xf32>
      %27 = arith.mulf %26, %25 : vector<16x64xf32>
      %28 = arith.mulf %15, %27 : vector<16x64xf32>
      %29 = arith.truncf %28 : vector<16x64xf32> to vector<16x64xbf16>
      %c0_18 = arith.constant 0 : index
      %c0_19 = arith.constant 0 : index
      %30 = vector.load %arg6[%c0_18, %c0_19] : memref<16x64xbf16, #tpu.memory_space<vmem>>, vector<16x64xbf16>
      tpu.vector_store %arg6[%c0_18, %c0_19], %29 {strides = array<i32>} : memref<16x64xbf16, #tpu.memory_space<vmem>>, vector<16x64xbf16>,
    } else {
    }
    return
  }
  func.func @transform_0(%arg0: i32, %arg1: i32, %arg2: i32) -> (i32, i32) {
    %c0_i32 = arith.constant 0 : i32
    return %arg0, %arg2 : i32, i32
  }
  func.func @transform_1(%arg0: i32, %arg1: i32, %arg2: i32) -> (i32, i32) {
    %c0_i32 = arith.constant 0 : i32
    return %arg2, %arg1 : i32, i32
  }
  func.func @transform_2(%arg0: i32, %arg1: i32, %arg2: i32) -> (i32, i32) {
    %c0_i32 = arith.constant 0 : i32
    %c0_i32_0 = arith.constant 0 : i32
    return %c0_i32, %arg1 : i32, i32
  }
  func.func @transform_3(%arg0: i32, %arg1: i32, %arg2: i32) -> (i32, i32) {
    %c0_i32 = arith.constant 0 : i32
    return %arg0, %arg1 : i32, i32
  }
}

module attributes {stable_mosaic.version = 11 : i64} {
  func.func @_linear_kernel(%arg0: i32, %arg1: i32, %arg2: i32, %arg3: memref<16x64xbf16, #tpu.memory_space<vmem>>, %arg4: memref<64x32xbf16, #tpu.memory_space<vmem>>, %arg5: memref<1x32xf32, #tpu.memory_space<vmem>>, %arg6: memref<16x32xbf16, #tpu.memory_space<vmem>>, %arg7: memref<16x32xf32, #tpu.memory_space<vmem>>) attributes {dimension_semantics = [#tpu.dimension_semantics<parallel>, #tpu.dimension_semantics<parallel>, #tpu.dimension_semantics<arbitrary>], iteration_bounds = array<i64: 1, 1, 1>, scalar_prefetch = 0 : i64, scratch_operands = 1 : i64, tpu.core_type = #tpu.core_type<tc>, window_params = [{transform_indices = @transform_0, window_bounds = array<i64: 16, 64>}, {transform_indices = @transform_1, window_bounds = array<i64: 64, 32>}, {transform_indices = @transform_2, window_bounds = array<i64: 1, 32>}, {transform_indices = @transform_3, window_bounds = array<i64: 16, 32>}]} {
    %c0_i32 = arith.constant 0 : i32
    %0 = arith.cmpi eq, %arg2, %c0_i32 : i32
    %1 = arith.extui %0 : i1 to i32
    %c0_i32_0 = arith.constant 0 : i32
    %2 = arith.cmpi ne, %1, %c0_i32_0 : i32
    scf.if %2 {
      %cst_10 = arith.constant 0.000000e+00 : f32
      %12 = vector.broadcast %cst_10 : f32 to vector<16x32xf32>
      %c0_11 = arith.constant 0 : index
      %c0_12 = arith.constant 0 : index
      %13 = vector.load %arg7[%c0_11, %c0_12] : memref<16x32xf32, #tpu.memory_space<vmem>>, vector<16x32xf32>
      tpu.vector_store %arg7[%c0_11, %c0_12], %12 {strides = array<i32>} : memref<16x32xf32, #tpu.memory_space<vmem>>, vector<16x32xf32>,
    } else {
    }
    %c0 = arith.constant 0 : index
    %c0_1 = arith.constant 0 : index
    %3 = vector.load %arg7[%c0, %c0_1] : memref<16x32xf32, #tpu.memory_space<vmem>>, vector<16x32xf32>
    %c0_2 = arith.constant 0 : index
    %c0_3 = arith.constant 0 : index
    %4 = vector.load %arg3[%c0_2, %c0_3] : memref<16x64xbf16, #tpu.memory_space<vmem>>, vector<16x64xbf16>
    %c0_4 = arith.constant 0 : index
    %c0_5 = arith.constant 0 : index
    %5 = vector.load %arg4[%c0_4, %c0_5] : memref<64x32xbf16, #tpu.memory_space<vmem>>, vector<64x32xbf16>
    %cst = arith.constant dense<0.000000e+00> : vector<16x32xf32>
    %6 = tpu.matmul %4, %5, %cst {dimension_numbers = #tpu.dot_dimension_numbers<[1], [0], [0], [1], [0, 0, 1, 1], [], []>} : vector<16x64xbf16>, vector<64x32xbf16>, vector<16x32xf32> -> vector<16x32xf32>
    %7 = arith.addf %3, %6 : vector<16x32xf32>
    %c0_6 = arith.constant 0 : index
    %c0_7 = arith.constant 0 : index
    %8 = vector.load %arg7[%c0_6, %c0_7] : memref<16x32xf32, #tpu.memory_space<vmem>>, vector<16x32xf32>
    tpu.vector_store %arg7[%c0_6, %c0_7], %7 {strides = array<i32>} : memref<16x32xf32, #tpu.memory_space<vmem>>, vector<16x32xf32>,
    %c0_i32_8 = arith.constant 0 : i32
    %9 = arith.cmpi eq, %arg2, %c0_i32_8 : i32
    %10 = arith.extui %9 : i1 to i32
    %c0_i32_9 = arith.constant 0 : i32
    %11 = arith.cmpi ne, %10, %c0_i32_9 : i32
    scf.if %11 {
      %c0_10 = arith.constant 0 : index
      %c0_11 = arith.constant 0 : index
      %12 = vector.load %arg7[%c0_10, %c0_11] : memref<16x32xf32, #tpu.memory_space<vmem>>, vector<16x32xf32>
      %c0_12 = arith.constant 0 : index
      %c0_13 = arith.constant 0 : index
      %13 = vector.load %arg5[%c0_12, %c0_13] : memref<1x32xf32, #tpu.memory_space<vmem>>, vector<1x32xf32>
      %14 = vector.broadcast %13 : vector<1x32xf32> to vector<16x32xf32>
      %15 = arith.addf %12, %14 : vector<16x32xf32>
      %16 = arith.truncf %15 : vector<16x32xf32> to vector<16x32xbf16>
      %c0_14 = arith.constant 0 : index
      %c0_15 = arith.constant 0 : index
      %17 = vector.load %arg6[%c0_14, %c0_15] : memref<16x32xbf16, #tpu.memory_space<vmem>>, vector<16x32xbf16>
      tpu.vector_store %arg6[%c0_14, %c0_15], %16 {strides = array<i32>} : memref<16x32xbf16, #tpu.memory_space<vmem>>, vector<16x32xbf16>,
    } else {
    }
    return
  }
  func.func @transform_0(%arg0: i32, %arg1: i32, %arg2: i32) -> (i32, i32) {
    %c0_i32 = arith.constant 0 : i32
    return %arg0, %arg2 : i32, i32
  }
  func.func @transform_1(%arg0: i32, %arg1: i32, %arg2: i32) -> (i32, i32) {
    %c0_i32 = arith.constant 0 : i32
    return %arg2, %arg1 : i32, i32
  }
  func.func @transform_2(%arg0: i32, %arg1: i32, %arg2: i32) -> (i32, i32) {
    %c0_i32 = arith.constant 0 : i32
    %c0_i32_0 = arith.constant 0 : i32
    return %c0_i32, %arg1 : i32, i32
  }
  func.func @transform_3(%arg0: i32, %arg1: i32, %arg2: i32) -> (i32, i32) {
    %c0_i32 = arith.constant 0 : i32
    return %arg0, %arg1 : i32, i32
  }
}

</mosaic_0001>

<bundles_post_ra>
// kernel: distilbert_forward.14
= control target key start
LH: loop header
LB: loop body
LE: loop exit
PB: predicated region body
PF: predicated region fallthrough
CT: control target
= control target key end

     0   :  { %vm19_vm0 = vcmask 785408   ;;  %v151_v0 = vmov 0.0   ;;  %vm152_vm1 = vmmov 0   ;;  %vm47_vm2 = vcmask 261120   ;;  %s195_s1 = inlined_call_operand.vmem [shape: bf16[32,96], index: 1, kind: input, shape index: {}]   ;;  %s196_s0 = inlined_call_operand.vmem [shape: bf16[16,32], index: 0, kind: input, shape index: {}]   ;;  %s197_s2 = inlined_call_operand.vmem [shape: f32[1,96], index: 2, kind: input, shape index: {}]   ;;  %s198_s3 = inlined_call_operand.vmem [shape: bf16[16,96], index: 3, kind: output, shape index: {}]  }
   0x1   :  { %138 = vmatprep.subr.bf16.mxu0 %v151_v0  ;;  %v148_v1 = vld [vmem:[%s195_s1 + $0x8] sm:$0xff]   ;;  %142 = vmatprep.mubr.msk.bf16.mxu0 %vm152_vm1, %v151_v0  ;;  %20 = vst.msk [vmem:[#allocation2] sm:$0xff] %vm19_vm0, %v151_v0  ;;  %21 = vst.msk [vmem:[#allocation2 + $0x8] sm:$0xff] %vm19_vm0, %v151_v0  ;;  %v149_v2 = vld [vmem:[%s195_s1] sm:$0xff]   ;;  %vm119_vm3 = vcmask 781312  }
   0x2   :  { %139 = vmatpush3.bf16.msra.mxu0 %v148_v1  ;;  %v150_v3 = vld [vmem:[%s196_s0] sm:$0xff]  }
   0x3   :  { %140 = vmatprep.subr.bf16.mxu0 %v151_v0  ;;  %v130_v12 = vld [vmem:[%s197_s2] ss:$0 sm:$0xff] }
   0x6   :  { %141 = vmatpush3.bf16.msra.mxu0 %v149_v2 }
   0x8   :  { %v22_v4 = vld [vmem:[#allocation2] sm:$0xff]  ;;  %v23_v8 = vld [vmem:[#allocation2 + $0x8] sm:$0xff] }
   0x9   :  { %143 = vmatmul.mubr.msk.bf16.vlgmr.msra.gmra.mxu0 %vm47_vm2, %v150_v3 }
  0xc9   :  { %v85_v5 = vpop.f32.mrf.mxu0 }
  0xca   :  { %v92_v6 = vadd.f32 %v85_v5, %v22_v4 }
  0xcb   :  { %v144_v7 = vpop.f32.mrf.mxu0 }
  0xcc   :  { %95 = vst.msk [vmem:[#allocation2] sm:$0xff] %vm19_vm0, %v92_v6 }
  0xcd   :  { %v88_v9 = vpop.f32.mrf.mxu0 }
  0xce   :  { %v93_v10 = vadd.f32 %v88_v9, %v23_v8 }
  0xcf   :  { %v145_v11 = vpop.f32.mrf.mxu0 }
  0xd0   :  { %96 = vst.msk [vmem:[#allocation2 + $0x8] sm:$0xff] %vm19_vm0, %v93_v10 }
  0xd3   :  { %v100_v13 = vld [vmem:[#allocation2] sm:$0xff] }
  0xd4   :  { %v109_v14 = vadd.f32 %v130_v12, %v100_v13 }
  0xd6   :  { %v133_v15 = vpack.c.bf16 %v109_v14, %v109_v14 }
  0xd7   :  { %v101_v16 = vld [vmem:[#allocation2 + $0x8] sm:$0xff] }
  0xd8   :  { %120 = vst.msk [vmem:[%s198_s3] sm:$0xf] %vm119_vm3, %v133_v15  ;;  %v110_v17 = vadd.f32 %v130_v12, %v101_v16 }
  0xda   :  { %v134_v18 = vpack.c.bf16 %v110_v17, %v110_v17 }
  0xdc   :  { %121 = vst.msk [vmem:[%s198_s3 + $0x4] sm:$0xf] %vm119_vm3, %v134_v18 }

// kernel: distilbert_forward.16
= control target key start
LH: loop header
LB: loop body
LE: loop exit
PB: predicated region body
PF: predicated region fallthrough
CT: control target
= control target key end

     0   :  { %vm27_vm0 = vcmask 261120   ;;  %vm81_vm1 = vcmask 257024   ;;  %s153_s0 = inlined_call_operand.vmem [shape: bf16[16,32], index: 0, kind: input, shape index: {}]   ;;  %s154_s1 = inlined_call_operand.vmem [shape: bf16[16,32], index: 1, kind: input, shape index: {}]   ;;  %s155_s2 = inlined_call_operand.vmem [shape: f32[1,32], index: 2, kind: input, shape index: {}]   ;;  %s156_s3 = inlined_call_operand.vmem [shape: f32[1,32], index: 3, kind: input, shape index: {}]   ;;  %s157_s4 = inlined_call_operand.vmem [shape: bf16[16,32], index: 4, kind: output, shape index: {}]  }
   0x1   :  { %v95_v0 = vld [vmem:[%s153_s0] sm:$0xff]  }
   0x2   :  { %v99_v1 = vld [vmem:[%s154_s1] sm:$0xff]   ;;  %v96_v2 = vunpack.c.l.bf16 %v95_v0  ;;  %v97_v4 = vunpack.c.h.bf16 %v95_v0 }
   0x3   :  { %v100_v3 = vunpack.c.l.bf16 %v99_v1  ;;  %v101_v5 = vunpack.c.h.bf16 %v99_v1  ;;  %v88_v27 = vld [vmem:[%s155_s2] ss:$0 sm:$0xff] }
   0x4   :  { %v89_v29 = vld [vmem:[%s156_s3] ss:$0 sm:$0xff] }
   0x5   :  { %v25_v6 = vadd.f32 %v100_v3, %v96_v2  ;;  %v26_v7 = vadd.f32 %v101_v5, %v97_v4 }
   0x7   :  { %v28_v8 = vsel %vm27_vm0, %v25_v6, 0.0  ;;  %v31_v9 = vsel %vm27_vm0, %v26_v7, 0.0 }
   0x8   :  { %29 = vadd.xlane.f32.xlu0 %v28_v8 }
   0xc   :  { %32 = vadd.xlane.f32.xlu0 %v31_v9 }
  0x91   :  { %v30_v10 = vpop.xlane.xlu0 %29 }
  0x92   :  { %v35_v11 = vmul.f32 0.03125, %v30_v10 }
  0x94   :  { %v37_v12 = vsub.f32 %v25_v6, %v35_v11 }
  0x95   :  { %v33_v13 = vpop.xlane.xlu0 %32 }
  0x96   :  { %v36_v14 = vmul.f32 0.03125, %v33_v13  ;;  %v39_v15 = vmul.f32 %v37_v12, %v37_v12 }
  0x98   :  { %v38_v16 = vsub.f32 %v26_v7, %v36_v14  ;;  %v41_v17 = vsel %vm27_vm0, %v39_v15, 0.0 }
  0x99   :  { %42 = vadd.xlane.f32.xlu1 %v41_v17 }
  0x9a   :  { %v40_v18 = vmul.f32 %v38_v16, %v38_v16 }
  0x9c   :  { %v44_v19 = vsel %vm27_vm0, %v40_v18, 0.0 }
  0x9d   :  { %45 = vadd.xlane.f32.xlu1 %v44_v19 }
 0x122   :  { %v43_v20 = vpop.xlane.xlu1 %42 }
 0x123   :  { %v47_v21 = vmul.f32 0.03125, %v43_v20 }
 0x125   :  { %v49_v22 = vadd.f32 1e-12, %v47_v21 }
 0x126   :  { %v46_v23 = vpop.xlane.xlu1 %45 }
 0x127   :  { %102 = vrsqrt.f32 %v49_v22  ;;  %v48_v24 = vmul.f32 0.03125, %v46_v23 }
 0x129   :  { %v50_v25 = vadd.f32 1e-12, %v48_v24 }
 0x12b   :  { %104 = vrsqrt.f32 %v50_v25 }
 0x134   :  { %v103_v26 = vpop.eup %102 }
 0x135   :  { %v53_v28 = vmul.f32 %v103_v26, %v37_v12 }
 0x137   :  { %v62_v30 = vmul.f32 %v88_v27, %v53_v28 }
 0x138   :  { %v105_v31 = vpop.eup %104 }
 0x139   :  { %v71_v32 = vadd.f32 %v89_v29, %v62_v30  ;;  %v54_v33 = vmul.f32 %v105_v31, %v38_v16 }
 0x13b   :  { %v92_v34 = vpack.c.bf16 %v71_v32, %v71_v32  ;;  %v63_v35 = vmul.f32 %v88_v27, %v54_v33 }
 0x13d   :  { %82 = vst.msk [vmem:[%s157_s4] sm:$0xf] %vm81_vm1, %v92_v34  ;;  %v72_v36 = vadd.f32 %v89_v29, %v63_v35 }
 0x13f   :  { %v93_v37 = vpack.c.bf16 %v72_v36, %v72_v36 }
 0x141   :  { %83 = vst.msk [vmem:[%s157_s4 + $0x4] sm:$0xf] %vm81_vm1, %v93_v37 }

// kernel: distilbert_forward.13
= control target key start
LH: loop header
LB: loop body
LE: loop exit
PB: predicated region body
PF: predicated region fallthrough
CT: control target
= control target key end

     0   :  { %vm23_vm0 = vcmask 261120   ;;  %vm77_vm1 = vcmask 257024   ;;  %s147_s0 = inlined_call_operand.vmem [shape: f32[16,32], index: 0, kind: input, shape index: {}]   ;;  %s148_s1 = inlined_call_operand.vmem [shape: f32[16,32], index: 1, kind: input, shape index: {}]   ;;  %s149_s2 = inlined_call_operand.vmem [shape: f32[1,32], index: 2, kind: input, shape index: {}]   ;;  %s150_s3 = inlined_call_operand.vmem [shape: f32[1,32], index: 3, kind: input, shape index: {}]   ;;  %s151_s4 = inlined_call_operand.vmem [shape: bf16[16,32], index: 4, kind: output, shape index: {}]  }
   0x1   :  { %v17_v0 = vld [vmem:[%s147_s0] sm:$0xff]  ;;  %v18_v2 = vld [vmem:[%s147_s0 + $0x8] sm:$0xff] }
   0x2   :  { %v19_v1 = vld [vmem:[%s148_s1] sm:$0xff]  ;;  %v20_v4 = vld [vmem:[%s148_s1 + $0x8] sm:$0xff] }
   0x3   :  { %v21_v3 = vadd.f32 %v19_v1, %v17_v0  ;;  %v22_v5 = vadd.f32 %v20_v4, %v18_v2  ;;  %v84_v25 = vld [vmem:[%s149_s2] ss:$0 sm:$0xff] }
   0x4   :  { %v85_v27 = vld [vmem:[%s150_s3] ss:$0 sm:$0xff] }
   0x5   :  { %v24_v6 = vsel %vm23_vm0, %v21_v3, 0.0  ;;  %v27_v7 = vsel %vm23_vm0, %v22_v5, 0.0 }
   0x6   :  { %25 = vadd.xlane.f32.xlu0 %v24_v6 }
   0xa   :  { %28 = vadd.xlane.f32.xlu0 %v27_v7 }
  0x8f   :  { %v26_v8 = vpop.xlane.xlu0 %25 }
  0x90   :  { %v31_v9 = vmul.f32 0.03125, %v26_v8 }
  0x92   :  { %v33_v10 = vsub.f32 %v21_v3, %v31_v9 }
  0x93   :  { %v29_v11 = vpop.xlane.xlu0 %28 }
  0x94   :  { %v32_v12 = vmul.f32 0.03125, %v29_v11  ;;  %v35_v13 = vmul.f32 %v33_v10, %v33_v10 }
  0x96   :  { %v34_v14 = vsub.f32 %v22_v5, %v32_v12  ;;  %v37_v15 = vsel %vm23_vm0, %v35_v13, 0.0 }
  0x97   :  { %38 = vadd.xlane.f32.xlu1 %v37_v15 }
  0x98   :  { %v36_v16 = vmul.f32 %v34_v14, %v34_v14 }
  0x9a   :  { %v40_v17 = vsel %vm23_vm0, %v36_v16, 0.0 }
  0x9b   :  { %41 = vadd.xlane.f32.xlu1 %v40_v17 }
 0x120   :  { %v39_v18 = vpop.xlane.xlu1 %38 }
 0x121   :  { %v43_v19 = vmul.f32 0.03125, %v39_v18 }
 0x123   :  { %v45_v20 = vadd.f32 1e-12, %v43_v19 }
 0x124   :  { %v42_v21 = vpop.xlane.xlu1 %41 }
 0x125   :  { %90 = vrsqrt.f32 %v45_v20  ;;  %v44_v22 = vmul.f32 0.03125, %v42_v21 }
 0x127   :  { %v46_v23 = vadd.f32 1e-12, %v44_v22 }
 0x129   :  { %92 = vrsqrt.f32 %v46_v23 }
 0x132   :  { %v91_v24 = vpop.eup %90 }
 0x133   :  { %v49_v26 = vmul.f32 %v91_v24, %v33_v10 }
 0x135   :  { %v58_v28 = vmul.f32 %v84_v25, %v49_v26 }
 0x136   :  { %v93_v29 = vpop.eup %92 }
 0x137   :  { %v67_v30 = vadd.f32 %v85_v27, %v58_v28  ;;  %v50_v31 = vmul.f32 %v93_v29, %v34_v14 }
 0x139   :  { %v88_v32 = vpack.c.bf16 %v67_v30, %v67_v30  ;;  %v59_v33 = vmul.f32 %v84_v25, %v50_v31 }
 0x13b   :  { %78 = vst.msk [vmem:[%s151_s4] sm:$0xf] %vm77_vm1, %v88_v32  ;;  %v68_v34 = vadd.f32 %v85_v27, %v59_v33 }
 0x13d   :  { %v89_v35 = vpack.c.bf16 %v68_v34, %v68_v34 }
 0x13f   :  { %79 = vst.msk [vmem:[%s151_s4 + $0x4] sm:$0xf] %vm77_vm1, %v89_v35 }

// kernel: distilbert_forward.15
= control target key start
LH: loop header
LB: loop body
LE: loop exit
PB: predicated region body
PF: predicated region fallthrough
CT: control target
= control target key end

     0   :  { %s1044_s15 = smov 0   ;;  %s1162_s0 = inlined_call_operand.vmem [shape: bf16[2,8,96], index: 0, kind: input, shape index: {}]   ;;  %s1163_s1 = inlined_call_operand.vmem [shape: f32[2,1,8], index: 1, kind: input, shape index: {}]   ;;  %s1164_s2 = inlined_call_operand.vmem [shape: bf16[32,32], index: 2, kind: input, shape index: {}]   ;;  %s1165_s3 = inlined_call_operand.vmem [shape: f32[1,32], index: 3, kind: input, shape index: {}]   ;;  %s1166_s4 = inlined_call_operand.vmem [shape: bf16[2,8,32], index: 4, kind: output, shape index: {}]  }
   0x1 LB: > { %s842_s16 = sadd.s32 4294967295, %s1001_s15   ;;  %p846_p0 = scmp.ge.s32.totalorder %s1001_s15, 1  ;;  %s1001_s15 = sphi %s1044_s15, %s14_s15  }
   0x2   : > { %p169_p1 = scmp.lt.s32.totalorder %s1001_s15, 3 }
   0x4   : > { %p170_p2 = pnand %p846_p0, %p169_p1 }
   0x5   : > { %p196_p3 = scmp.lt.s32.totalorder (!%p170_p2), %s842_s16, 1  ;;  %s1005_s21 = smov (!%p170_p2), 96  }
   0x6   : > { %173 = sbr.rel (%p170_p2) target bundleno = 1440 (0x5a0), region = 36  ;;  %s1006_s22 = smov (!%p170_p2), 64  }
   0x7   : > { %s1007_s23 = smov (!%p170_p2), 88   ;;  %s1008_s24 = smov (!%p170_p2), 120  }
   0x8   : > { %s1009_s25 = smov (!%p170_p2), 80   ;;  %s1010_s26 = smov (!%p170_p2), 112  }
   0x9   : > { %s1011_s27 = smov (!%p170_p2), 72   ;;  %s1012_s28 = smov (!%p170_p2), 104  }
   0xa   : > { %s1013_s6 = smov (!%p170_p2), 48   ;;  %s1014_s7 = smov (!%p170_p2), 56  }
   0xb   : > { %v1003_v0 = vmov 0.0   ;;  %vm1004_vm0 = vmmov 0   ;;  %s1168_s16 = smov (!%p196_p3, %s842_s16), 1  ;;  %vm215_vm1 = vcmask 64512   ;;  %vm285_vm2 = vcmask 1043456   ;;  %s1015_s8 = smov 40  }
   0xc   : > { %893 = vmatprep.subr.bf16.mxu0 %v1003_v0  ;;  %895 = vmatprep.mubr.msk.bf16.mxu0 %vm1004_vm0, %v1003_v0  ;;  %s847_s17 = sshll.u32 %s1168_s16, 2  ;;  %s202_s5 = scalar_lea.vmem %s1163_s1, %s1168_s16  ;;  %vm332_vm3 = vcmask 60416   ;;  %vm457_vm4 = vcmask 126016   ;;  %vm582_vm5 = vcmask 191616   ;;  %vm707_vm6 = vcmask 257216  }
   0xd   : > { %899 = vmatprep.subr.bf16.mxu1 %v1003_v0  ;;  %901 = vmatprep.mubr.msk.bf16.mxu1 %vm1004_vm0, %v1003_v0  ;;  %s199_s20 = scalar_lea.vmem %s1162_s0, %s847_s17  ;;  %v1087_v9 = vld [vmem:[%s202_s5] ss:$0 sm:$0xff]  ;;  %s1016_s9 = smov 8   ;;  %vm733_vm7 = vcmask 261120   ;;  %vm778_vm8 = vcmask 257024  }
   0xe   : > { %v209_v1 = vld [vmem:[%s199_s20] sm:$0xf]  ;;  %s1017_s10 = smov 16   ;;  %s1018_s18 = smov 24  }
   0xf   : > { %v849_v2 = vcombine.low %v209_v1, %v209_v1  ;;  %v1071_v5 = vld [vmem:[%s199_s20] ss:$0 sps:$4 sm:$0xff]  }
  0x10   : > { %v1075_v6 = vld [vmem:[%s199_s20] ss:$0 sps:$4 sm:$0xff]  }
  0x11   : > { %213 = vrot.lane.b32.xlu0 %v849_v2, %s1005_s21  ;;  %280 = vrot.lane.b32.xlu1 %v849_v2, %s1006_s22  ;;  %v1079_v7 = vld [vmem:[%s199_s20] ss:$0 sps:$4 sm:$0xff]  }
  0x15   : > { %340 = vrot.lane.b32.xlu1 %v1071_v5, %s1007_s23  ;;  %s206_s23 = scalar_lea.vmem %s1166_s4, %s847_s17 }
  0x19   : > { %338 = vrot.lane.b32.xlu1 %v1071_v5, %s1008_s24 }
  0x1d   : > { %465 = vrot.lane.b32.xlu1 %v1075_v6, %s1009_s25 }
  0x21   : > { %463 = vrot.lane.b32.xlu1 %v1075_v6, %s1010_s26 }
  0x25   : > { %590 = vrot.lane.b32.xlu1 %v1079_v7, %s1011_s27 }
  0x29   : > { %588 = vrot.lane.b32.xlu1 %v1079_v7, %s1012_s28 }
  0x83   : > { %v214_v3 = vpop.permute.xlu0 %213  ;;  %v281_v16 = vpop.permute.xlu1 %280 }
  0x84   : > { %v220_v4 = vsel %vm215_vm1, %v214_v3, 0  ;;  %v287_v17 = vsel %vm285_vm2, %v281_v16, 0 }
  0x85   : > { %894 = vmatpush3.bf16.xpose.msra.mxu0 %v220_v4  ;;  %900 = vmatpush3.bf16.msra.mxu1 %v287_v17 }
  0x86   : > { %911 = vmatprep.subr.bf16.mxu0 %v1003_v0  ;;  %905 = vmatprep.subr.bf16.mxu1 %v1003_v0 }
  0x87   : > { %v341_v21 = vpop.permute.xlu1 %340 }
  0x88   : > { %v346_v24 = vsel %vm215_vm1, %v341_v21, 0 }
  0x8b   : > { %v339_v23 = vpop.permute.xlu1 %338 }
  0x8c   : > { %896 = vmatmul.mubr.msk.bf16.vlgmr.msra.gmra.mxu0 %vm215_vm1, %v209_v1 }
  0x8d   : > { %913 = vmatprep.mubr.msk.bf16.mxu0 %vm1004_vm0, %v1003_v0 }
  0x8f   : > { %v466_v26 = vpop.permute.xlu1 %465 }
  0x90   : > { %v471_v27 = vsel %vm215_vm1, %v466_v26, 0 }
  0x93   : > { %v464_v28 = vpop.permute.xlu1 %463 }
  0x97   : > { %v591_v29 = vpop.permute.xlu1 %590 }
  0x98   : > { %v596_v30 = vsel %vm215_vm1, %v591_v29, 0 }
  0x9b   : > { %v589_v31 = vpop.permute.xlu1 %588 }
 0x14c   : > { %v256_v8 = vpop.f32.mrf.mxu0 }
 0x14d   : > { %v262_v10 = vmul.f32 0.35355338, %v256_v8 }
 0x14e   : > { %v897_v11 = vpop.f32.mrf.mxu0 }
 0x14f   : > { %v269_v12 = vadd.f32 %v1087_v9, %v262_v10 }
 0x150   : > { %v259_v13 = vpop.f32.mrf.mxu0 }
 0x151   : > { %v270_v14 = vsel %vm215_vm1, %v269_v12, -inf }
 0x152   : > { %271 = vmax.xlane.f32.xlu0 %v270_v14  ;;  %v898_v15 = vpop.f32.mrf.mxu0 }
 0x1db   : > { %v272_v18 = vpop.xlane.xlu0 %271 }
 0x1dc   : > { %v273_v19 = vsub.f32 %v269_v12, %v272_v18 }
 0x1de   : > { %v274_v20 = vmul.f32 1.442695, %v273_v19 }
 0x1e0   : > { %979 = vpow2.f32 %v274_v20 }
 0x1ed   : > { %v1093_v22 = vpop.eup %979 }
 0x1ee   : > { %v279_v25 = vpack.c.bf16 %v1093_v22, %v1093_v22  ;;  %v276_v18 = vsel %vm215_vm1, %v1093_v22, 0.0 }
 0x1f0   : > { %902 = vmatmul.mubr.msk.bf16.vlgmr.msra.gmra.mxu1 %vm215_vm1, %v279_v25 }
 0x1f1   : > { %906 = vmatpush3.bf16.xpose.msra.mxu1 %v346_v24  ;;  %907 = vmatprep.mubr.msk.bf16.mxu1 %vm1004_vm0, %v1003_v0 }
 0x1f2   : > { %917 = vmatprep.subr.bf16.mxu1 %v1003_v0 }
 0x1f8   : > { %908 = vmatmul.mubr.msk.bf16.vlgmr.msra.gmra.mxu1 %vm215_vm1, %v339_v23 }
 0x1f9   : > { %918 = vmatpush3.bf16.xpose.msra.mxu1 %v471_v27  ;;  %919 = vmatprep.mubr.msk.bf16.mxu1 %vm1004_vm0, %v1003_v0 }
 0x1fa   : > { %929 = vmatprep.subr.bf16.mxu1 %v1003_v0 }
 0x200   : > { %920 = vmatmul.mubr.msk.bf16.vlgmr.msra.gmra.mxu1 %vm215_vm1, %v464_v28 }
 0x201   : > { %930 = vmatpush3.bf16.xpose.msra.mxu1 %v596_v30  ;;  %931 = vmatprep.mubr.msk.bf16.mxu1 %vm1004_vm0, %v1003_v0 }
 0x202   : > { %941 = vmatprep.subr.bf16.mxu1 %v1003_v0 }
 0x208   : > { %932 = vmatmul.mubr.msk.bf16.vlgmr.msra.gmra.mxu1 %vm215_vm1, %v589_v31 }
 0x209   : > { %945 = vmatprep.mubr.msk.bf16.mxu1 %vm1004_vm0, %v1003_v0 }
 0x2b0   : > { %v1115_v32 = vpop.f32.mrf.mxu1 }
 0x2b2   : > { %v903_v33 = vpop.f32.mrf.mxu1 }
 0x2b4   : > { %v326_v34 = vpop.f32.mrf.mxu1 }
 0x2b6   : > { %v904_v35 = vpop.f32.mrf.mxu1 }
 0x2b8   : > { %v382_v36 = vpop.f32.mrf.mxu1 }
 0x2b9   : > { %v388_v37 = vmul.f32 0.35355338, %v382_v36 }
 0x2ba   : > { %v909_v38 = vpop.f32.mrf.mxu1 }
 0x2bb   : > { %v389_v39 = vadd.f32 %v1087_v9, %v388_v37 }
 0x2bc   : > { %v385_v40 = vpop.f32.mrf.mxu1 }
 0x2bd   : > { %v390_v41 = vsel %vm215_vm1, %v389_v39, -inf }
 0x2be   : > { %391 = vmax.xlane.f32.xlu1 %v390_v41  ;;  %v910_v42 = vpop.f32.mrf.mxu1  ;;  %v977_v41 = vld [vmem:[%s1164_s2 + $0x8] sm:$0xff]  }
 0x2bf   : > { %942 = vmatpush3.bf16.msra.mxu1 %v977_v41  ;;  %v978_v42 = vld [vmem:[%s1164_s2] sm:$0xff]  }
 0x2c0   : > { %v507_v43 = vpop.f32.mrf.mxu1  ;;  %943 = vmatprep.subr.bf16.mxu1 %v1003_v0 }
 0x2c1   : > { %v513_v44 = vmul.f32 0.35355338, %v507_v43 }
 0x2c2   : > { %v921_v45 = vpop.f32.mrf.mxu1 }
 0x2c3   : > { %v514_v46 = vadd.f32 %v1087_v9, %v513_v44  ;;  %944 = vmatpush3.bf16.msra.mxu1 %v978_v42 }
 0x2c4   : > { %v510_v47 = vpop.f32.mrf.mxu1 }
 0x2c5   : > { %v515_v48 = vsel %vm215_vm1, %v514_v46, -inf }
 0x2c6   : > { %516 = vmax.xlane.f32.xlu0 %v515_v48  ;;  %v922_v49 = vpop.f32.mrf.mxu1 }
 0x2c8   : > { %v632_v50 = vpop.f32.mrf.mxu1 }
 0x2c9   : > { %v638_v54 = vmul.f32 0.35355338, %v632_v50 }
 0x2ca   : > { %v933_v51 = vpop.f32.mrf.mxu1 }
 0x2cb   : > { %v639_v55 = vadd.f32 %v1087_v9, %v638_v54 }
 0x2cc   : > { %v635_v52 = vpop.f32.mrf.mxu1 }
 0x2cd   : > { %v640_v56 = vsel %vm215_vm1, %v639_v55, -inf  ;;  %v865_v52 = vld [vmem:[%s1165_s3] ss:$0 sm:$0xff] }
 0x2ce   : > { %v934_v53 = vpop.f32.mrf.mxu1 }
 0x2cf   : > { %525 = vrot.lane.b32.xlu1 %v1075_v6, %s1013_s6 }
 0x2dc   : > { %400 = vrot.lane.b32.xlu0 %v1071_v5, %s1014_s7 }
 0x2fb   : > { %641 = vmax.xlane.f32.xlu0 %v640_v56 }
 0x311   : > { %650 = vrot.lane.b32.xlu0 %v1079_v7, %s1015_s8 }
 0x347   : > { %v392_v57 = vpop.xlane.xlu1 %391 }
 0x348   : > { %v393_v58 = vsub.f32 %v389_v39, %v392_v57 }
 0x34a   : > { %v394_v59 = vmul.f32 1.442695, %v393_v58 }
 0x34b   : > { %v526_v2 = vpop.permute.xlu1 %525 }
 0x34c   : > { %981 = vpow2.f32 %v394_v59  ;;  %v531_v6 = vsel %vm285_vm2, %v526_v2, 0 }
 0x34f   : > { %v517_v60 = vpop.xlane.xlu0 %516 }
 0x350   : > { %v518_v61 = vsub.f32 %v514_v46, %v517_v60 }
 0x352   : > { %v519_v62 = vmul.f32 1.442695, %v518_v61 }
 0x353   : > { %v401_v63 = vpop.permute.xlu0 %400 }
 0x354   : > { %983 = vpow2.f32 %v519_v62  ;;  %v406_v1 = vsel %vm285_vm2, %v401_v63, 0 }
 0x355   : > { %912 = vmatpush3.bf16.msra.mxu0 %v406_v1 }
 0x356   : > { %923 = vmatprep.subr.bf16.mxu0 %v1003_v0 }
 0x359   : > { %v982_v3 = vpop.eup %981 }
 0x35a   : > { %v396_v4 = vsel %vm215_vm1, %v982_v3, 0.0  ;;  %v399_v5 = vpack.c.bf16 %v982_v3, %v982_v3 }
 0x35b   : > { %397 = vadd.xlane.f32.xlu0 %v396_v4 }
 0x35c   : > { %914 = vmatmul.mubr.msk.bf16.vlgmr.msra.gmra.mxu0 %vm215_vm1, %v399_v5 }
 0x35d   : > { %924 = vmatpush3.bf16.msra.mxu0 %v531_v6  ;;  %925 = vmatprep.mubr.msk.bf16.mxu0 %vm1004_vm0, %v1003_v0 }
 0x35e   : > { %935 = vmatprep.subr.bf16.mxu0 %v1003_v0 }
 0x361   : > { %v984_v7 = vpop.eup %983 }
 0x362   : > { %v521_v8 = vsel %vm215_vm1, %v984_v7, 0.0  ;;  %v524_v9 = vpack.c.bf16 %v984_v7, %v984_v7 }
 0x363   : > { %522 = vadd.xlane.f32.xlu1 %v521_v8 }
 0x364   : > { %926 = vmatmul.mubr.msk.bf16.vlgmr.msra.gmra.mxu0 %vm215_vm1, %v524_v9 }
 0x365   : > { %937 = vmatprep.mubr.msk.bf16.mxu0 %vm1004_vm0, %v1003_v0 }
 0x384   : > { %v642_v10 = vpop.xlane.xlu0 %641 }
 0x385   : > { %v643_v11 = vsub.f32 %v639_v55, %v642_v10 }
 0x387   : > { %v644_v12 = vmul.f32 1.442695, %v643_v11 }
 0x388   : > { %v651_v13 = vpop.permute.xlu0 %650 }
 0x389   : > { %985 = vpow2.f32 %v644_v12  ;;  %v656_v14 = vsel %vm285_vm2, %v651_v13, 0 }
 0x38a   : > { %936 = vmatpush3.bf16.msra.mxu0 %v656_v14 }
 0x396   : > { %v986_v15 = vpop.eup %985 }
 0x397   : > { %v646_v16 = vsel %vm215_vm1, %v986_v15, 0.0  ;;  %v649_v17 = vpack.c.bf16 %v986_v15, %v986_v15 }
 0x398   : > { %647 = vadd.xlane.f32.xlu0 %v646_v16 }
 0x399   : > { %938 = vmatmul.mubr.msk.bf16.vlgmr.msra.gmra.mxu0 %vm215_vm1, %v649_v17 }
 0x39c   : > { %277 = vadd.xlane.f32.xlu0 %v276_v18 }
 0x3e4   : > { %v398_v19 = vpop.xlane.xlu0 %397 }
 0x3e5   : > { %987 = vrcp.f32 %v398_v19 }
 0x3ec   : > { %v523_v20 = vpop.xlane.xlu1 %522 }
 0x3ed   : > { %989 = vrcp.f32 %v523_v20 }
 0x3f2   : > { %v988_v21 = vpop.eup %987 }
 0x3fa   : > { %v990_v30 = vpop.eup %989 }
 0x41c   : > { %v442_v23 = vpop.f32.mrf.mxu0 }
 0x41d   : > { %v449_v24 = vmul.f32 %v988_v21, %v442_v23 }
 0x41e   : > { %v915_v25 = vpop.f32.mrf.mxu0 }
 0x41f   : > { %v871_v26 = vpack.c.bf16 %v449_v24, %v449_v24 }
 0x420   : > { %v445_v27 = vpop.f32.mrf.mxu0 }
 0x421   : > { %v648_v28 = vpop.xlane.xlu0 %647  ;;  %454 = vrot.lane.b32.xlu0 %v871_v26, %s1016_s9 }
 0x422   : > { %v916_v29 = vpop.f32.mrf.mxu0 }
 0x424   : > { %v567_v31 = vpop.f32.mrf.mxu0 }
 0x425   : > { %v574_v33 = vmul.f32 %v990_v30, %v567_v31  ;;  %v278_v34 = vpop.xlane.xlu0 %277 }
 0x426   : > { %991 = vrcp.f32 %v278_v34  ;;  %v927_v22 = vpop.f32.mrf.mxu0 }
 0x427   : > { %v872_v35 = vpack.c.bf16 %v574_v33, %v574_v33  ;;  %993 = vrcp.f32 %v648_v28 }
 0x428   : > { %v570_v36 = vpop.f32.mrf.mxu0 }
 0x429   : > { %579 = vrot.lane.b32.xlu1 %v872_v35, %s1017_s10 }
 0x42a   : > { %v928_v37 = vpop.f32.mrf.mxu0 }
 0x433   : > { %v992_v38 = vpop.eup %991 }
 0x434   : > { %v330_v39 = vmul.f32 %v992_v38, %v1115_v32  ;;  %v994_v43 = vpop.eup %993 }
 0x436   : > { %v331_v40 = vpack.c.bf16 %v330_v39, %v330_v39 }
 0x438   : > { %333 = vst.msk [vmem:[#allocation2] sm:$0xf] %vm332_vm3, %v331_v40 }
 0x459   : > { %v692_v44 = vpop.f32.mrf.mxu0 }
 0x45a   : > { %v699_v45 = vmul.f32 %v994_v43, %v692_v44 }
 0x45b   : > { %v939_v32 = vpop.f32.mrf.mxu0 }
 0x45c   : > { %v873_v46 = vpack.c.bf16 %v699_v45, %v699_v45 }
 0x45d   : > { %v695_v47 = vpop.f32.mrf.mxu0 }
 0x45e   : > { %704 = vrot.lane.b32.xlu0 %v873_v46, %s1018_s18 }
 0x45f   : > { %v940_v48 = vpop.f32.mrf.mxu0 }
 0x493   : > { %v455_v49 = vpop.permute.xlu0 %454 }
 0x494   : > { %458 = vst.msk [vmem:[#allocation2] sm:$0xf] %vm457_vm4, %v455_v49 }
 0x49b   : > { %v580_v50 = vpop.permute.xlu1 %579 }
 0x49c   : > { %583 = vst.msk [vmem:[#allocation2] sm:$0xf] %vm582_vm5, %v580_v50 }
 0x4d0   : > { %v705_v51 = vpop.permute.xlu0 %704 }
 0x4d1   : > { %708 = vst.msk [vmem:[#allocation2] sm:$0xf] %vm707_vm6, %v705_v51 }
 0x4d8   : > { %v709_v0 = vld [vmem:[#allocation2] sm:$0xf] }
 0x4d9   : > { %946 = vmatmul.mubr.msk.bf16.vlgmr.msra.gmra.mxu1 %vm733_vm7, %v709_v0 }
 0x599   : > { %v771_v53 = vpop.f32.mrf.mxu1 }
 0x59a   : > { %v772_v54 = vadd.f32 %v865_v52, %v771_v53 }
 0x59b   : > { %v947_v55 = vpop.f32.mrf.mxu1 }
 0x59c   : > { %v777_v56 = vpack.c.bf16 %v772_v54, %v772_v54 }
 0x59d   : > { %v774_v57 = vpop.f32.mrf.mxu1 }
 0x59e   : > { %779 = vst.msk [vmem:[%s206_s23] sm:$0xf] %vm778_vm8, %v777_v56 }
 0x59f   : > { %v948_v58 = vpop.f32.mrf.mxu1 }
 0x5a0 PF: > { %s14_s15 = sadd.s32 1, %s1001_s15  }
 0x5a1   : > { %p11_p4 = scmp.ge.s32.totalorder %s14_s15, 4  }
 0x5a3   :  { %13 = sbr.rel (!%p11_p4) target bundleno = 1 (0x1), region = 69 }

// kernel: distilbert_forward.17
= control target key start
LH: loop header
LB: loop body
LE: loop exit
PB: predicated region body
PF: predicated region fallthrough
CT: control target
= control target key end

     0   :  { %vm19_vm0 = vcmask 523264   ;;  %v173_v0 = vmov 0.0   ;;  %vm174_vm1 = vmmov 0   ;;  %vm47_vm2 = vcmask 261120   ;;  %s217_s1 = inlined_call_operand.vmem [shape: bf16[32,64], index: 1, kind: input, shape index: {}]   ;;  %s218_s0 = inlined_call_operand.vmem [shape: bf16[16,32], index: 0, kind: input, shape index: {}]   ;;  %s219_s2 = inlined_call_operand.vmem [shape: f32[1,64], index: 2, kind: input, shape index: {}]   ;;  %s220_s3 = inlined_call_operand.vmem [shape: bf16[16,64], index: 3, kind: output, shape index: {}]  }
   0x1   :  { %156 = vmatprep.subr.bf16.mxu0 %v173_v0  ;;  %v166_v1 = vld [vmem:[%s217_s1 + $0x8] sm:$0xff]   ;;  %160 = vmatprep.mubr.msk.bf16.mxu0 %vm174_vm1, %v173_v0  ;;  %20 = vst.msk [vmem:[#allocation2] sm:$0xff] %vm19_vm0, %v173_v0  ;;  %21 = vst.msk [vmem:[#allocation2 + $0x8] sm:$0xff] %vm19_vm0, %v173_v0  ;;  %v167_v2 = vld [vmem:[%s217_s1] sm:$0xff]   ;;  %vm137_vm3 = vcmask 519168  }
   0x2   :  { %157 = vmatpush3.bf16.msra.mxu0 %v166_v1  ;;  %v168_v3 = vld [vmem:[%s218_s0] sm:$0xff]  }
   0x3   :  { %158 = vmatprep.subr.bf16.mxu0 %v173_v0  ;;  %v148_v12 = vld [vmem:[%s219_s2] ss:$0 sm:$0xff] }
   0x6   :  { %159 = vmatpush3.bf16.msra.mxu0 %v167_v2 }
   0x8   :  { %v22_v4 = vld [vmem:[#allocation2] sm:$0xff]  ;;  %v23_v8 = vld [vmem:[#allocation2 + $0x8] sm:$0xff] }
   0x9   :  { %161 = vmatmul.mubr.msk.bf16.vlgmr.msra.gmra.mxu0 %vm47_vm2, %v168_v3 }
  0xc9   :  { %v85_v5 = vpop.f32.mrf.mxu0 }
  0xca   :  { %v92_v6 = vadd.f32 %v85_v5, %v22_v4 }
  0xcb   :  { %v162_v7 = vpop.f32.mrf.mxu0 }
  0xcc   :  { %95 = vst.msk [vmem:[#allocation2] sm:$0xff] %vm19_vm0, %v92_v6 }
  0xcd   :  { %v88_v9 = vpop.f32.mrf.mxu0 }
  0xce   :  { %v93_v10 = vadd.f32 %v88_v9, %v23_v8 }
  0xcf   :  { %v163_v11 = vpop.f32.mrf.mxu0 }
  0xd0   :  { %96 = vst.msk [vmem:[#allocation2 + $0x8] sm:$0xff] %vm19_vm0, %v93_v10 }
  0xd3   :  { %v100_v13 = vld [vmem:[#allocation2] sm:$0xff] }
  0xd4   :  { %v109_v14 = vadd.f32 %v148_v12, %v100_v13 }
  0xd6   :  { %v111_v15 = vmul.f32 %v109_v14, %v109_v14 }
  0xd7   :  { %v101_v16 = vld [vmem:[#allocation2 + $0x8] sm:$0xff] }
  0xd8   :  { %v113_v17 = vmul.f32 %v111_v15, %v109_v14  ;;  %v110_v18 = vadd.f32 %v148_v12, %v101_v16 }
  0xda   :  { %v115_v19 = vmul.f32 0.044715, %v113_v17  ;;  %v112_v20 = vmul.f32 %v110_v18, %v110_v18 }
  0xdc   :  { %v117_v21 = vadd.f32 %v115_v19, %v109_v14  ;;  %v114_v22 = vmul.f32 %v112_v20, %v110_v18 }
  0xde   :  { %v119_v23 = vmul.f32 0.7978846, %v117_v21  ;;  %v116_v24 = vmul.f32 0.044715, %v114_v22 }
  0xe0   :  { %169 = vtanh.f32 %v119_v23  ;;  %v118_v25 = vadd.f32 %v116_v24, %v110_v18 }
  0xe2   :  { %v120_v26 = vmul.f32 0.7978846, %v118_v25 }
  0xe4   :  { %171 = vtanh.f32 %v120_v26 }
  0xed   :  { %v170_v27 = vpop.eup %169 }
  0xee   :  { %v123_v28 = vadd.f32 1.0, %v170_v27 }
  0xf0   :  { %v125_v29 = vmul.f32 0.5, %v123_v28 }
  0xf1   :  { %v172_v30 = vpop.eup %171 }
  0xf2   :  { %v127_v31 = vmul.f32 %v125_v29, %v109_v14  ;;  %v124_v32 = vadd.f32 1.0, %v172_v30 }
  0xf4   :  { %v151_v33 = vpack.c.bf16 %v127_v31, %v127_v31  ;;  %v126_v34 = vmul.f32 0.5, %v124_v32 }
  0xf6   :  { %138 = vst.msk [vmem:[%s220_s3] sm:$0xf] %vm137_vm3, %v151_v33  ;;  %v128_v35 = vmul.f32 %v126_v34, %v110_v18 }
  0xf8   :  { %v152_v36 = vpack.c.bf16 %v128_v35, %v128_v35 }
  0xfa   :  { %139 = vst.msk [vmem:[%s220_s3 + $0x4] sm:$0xf] %vm137_vm3, %v152_v36 }

// kernel: distilbert_forward.18
= control target key start
LH: loop header
LB: loop body
LE: loop exit
PB: predicated region body
PF: predicated region fallthrough
CT: control target
= control target key end

     0   :  { %vm19_vm0 = vcmask 261120   ;;  %v177_v0 = vmov 0.0   ;;  %vm178_vm1 = vmmov 0   ;;  %vm63_vm2 = vcmask 523264   ;;  %s227_s1 = inlined_call_operand.vmem [shape: bf16[64,32], index: 1, kind: input, shape index: {}]   ;;  %s228_s0 = inlined_call_operand.vmem [shape: bf16[16,64], index: 0, kind: input, shape index: {}]   ;;  %s229_s2 = inlined_call_operand.vmem [shape: f32[1,32], index: 2, kind: input, shape index: {}]   ;;  %s230_s3 = inlined_call_operand.vmem [shape: bf16[16,32], index: 3, kind: output, shape index: {}]  }
   0x1   :  { %158 = vmatprep.subr.bf16.mxu0 %v177_v0  ;;  %v172_v1 = vld [vmem:[%s227_s1 + $0x18] sm:$0xff]   ;;  %166 = vmatprep.mubr.msk.bf16.mxu0 %vm178_vm1, %v177_v0  ;;  %20 = vst.msk [vmem:[#allocation2] sm:$0xff] %vm19_vm0, %v177_v0  ;;  %21 = vst.msk [vmem:[#allocation2 + $0x8] sm:$0xff] %vm19_vm0, %v177_v0  ;;  %v173_v2 = vld [vmem:[%s227_s1 + $0x10] sm:$0xff]   ;;  %vm135_vm3 = vcmask 257024  }
   0x2   :  { %159 = vmatpush3.bf16.msra.mxu0 %v172_v1  ;;  %v174_v3 = vld [vmem:[%s227_s1 + $0x8] sm:$0xff]   ;;  %v175_v4 = vld [vmem:[%s227_s1] sm:$0xff]  }
   0x3   :  { %160 = vmatprep.subr.bf16.mxu0 %v177_v0  ;;  %v176_v5 = vld [vmem:[%s228_s0] sm:$0xff]  }
   0x4   :  { %v148_v14 = vld [vmem:[%s229_s2] ss:$0 sm:$0xff] }
   0x6   :  { %161 = vmatpush3.bf16.msra.mxu0 %v173_v2 }
   0x7   :  { %162 = vmatprep.subr.bf16.mxu0 %v177_v0 }
   0x8   :  { %v22_v6 = vld [vmem:[#allocation2] sm:$0xff]  ;;  %v23_v10 = vld [vmem:[#allocation2 + $0x8] sm:$0xff] }
   0xa   :  { %163 = vmatpush3.bf16.msra.mxu0 %v174_v3 }
   0xb   :  { %164 = vmatprep.subr.bf16.mxu0 %v177_v0 }
   0xe   :  { %165 = vmatpush3.bf16.msra.mxu0 %v175_v4 }
  0x11   :  { %167 = vmatmul.mubr.msk.bf16.vlgmr.msra.gmra.mxu0 %vm63_vm2, %v176_v5 }
  0xd1   :  { %v101_v7 = vpop.f32.mrf.mxu0 }
  0xd2   :  { %v108_v8 = vadd.f32 %v101_v7, %v22_v6 }
  0xd3   :  { %v168_v9 = vpop.f32.mrf.mxu0 }
  0xd4   :  { %111 = vst.msk [vmem:[#allocation2] sm:$0xff] %vm19_vm0, %v108_v8 }
  0xd5   :  { %v104_v11 = vpop.f32.mrf.mxu0 }
  0xd6   :  { %v109_v12 = vadd.f32 %v104_v11, %v23_v10 }
  0xd7   :  { %v169_v13 = vpop.f32.mrf.mxu0 }
  0xd8   :  { %112 = vst.msk [vmem:[#allocation2 + $0x8] sm:$0xff] %vm19_vm0, %v109_v12 }
  0xdb   :  { %v116_v15 = vld [vmem:[#allocation2] sm:$0xff] }
  0xdc   :  { %v125_v16 = vadd.f32 %v148_v14, %v116_v15 }
  0xde   :  { %v151_v17 = vpack.c.bf16 %v125_v16, %v125_v16 }
  0xdf   :  { %v117_v18 = vld [vmem:[#allocation2 + $0x8] sm:$0xff] }
  0xe0   :  { %136 = vst.msk [vmem:[%s230_s3] sm:$0xf] %vm135_vm3, %v151_v17  ;;  %v126_v19 = vadd.f32 %v148_v14, %v117_v18 }
  0xe2   :  { %v152_v20 = vpack.c.bf16 %v126_v19, %v126_v19 }
  0xe4   :  { %137 = vst.msk [vmem:[%s230_s3 + $0x4] sm:$0xf] %vm135_vm3, %v152_v20 }

</bundles_post_ra>
